<compile_context>
chip_gen: v7x
topology: tpu7x:2x2x1
jax: 0.10.0
libtpu: 0.0.40
codegen_flags: <defaults>
</compile_context>

<pallas_src>
import functools

import jax
import jax.numpy as jnp
from jax.experimental import pallas as pl
from jax.experimental.pallas import tpu as pltpu

NEG_LOGIT = -1e30                   # pad-class bias: exp() == 0, max unaffected
DIMS = (784, 512, 256, 128, 64)     # feature widths before the classifier


def mlp_kernel(x_ref,
               w0, b0, w1, b1, w2, b2, w3, b3, w4, b4,
               out_ref):
    """One (TB, 784) batch tile through the full MLP; weights stay VMEM-resident."""

    def layer(h_bf16, w_ref, b_ref):
        # bf16 x bf16 -> f32 accumulate on the MXU; elementwise stays f32.
        y = jnp.dot(h_bf16, w_ref[...], preferred_element_type=jnp.float32)
        y = jnp.maximum(y + b_ref[...], 0.0)        # folded bias+BN, then ReLU
        return y.astype(jnp.bfloat16)               # feed next matmul in bf16

    h = x_ref[...]                                  # (TB, 784) bf16
    h = layer(h, w0, b0)                            # fc0+bn0+relu (+dropout=id)
    h = layer(h, w1, b1)                            # fc1+bn1+relu
    h = layer(h, w2, b2)                            # fc2+bn2+relu (+dropout=id)
    h = layer(h, w3, b3)                            # fc3+bn3+relu

    # Classifier, padded to a lane-dense (TB, 128) output.
    logits = jnp.dot(h, w4[...], preferred_element_type=jnp.float32) + b4[...]

    # Numerically stable log_softmax over the padded class axis (f32, row-wise).
    m = jnp.max(logits, axis=1, keepdims=True)
    z = logits - m
    lse = jnp.log(jnp.sum(jnp.exp(z), axis=1, keepdims=True))
    out_ref[...] = z - lse


def make_params(key, num_classes, eps=1e-5):
    """Deterministic synthetic raw parameters matching the PyTorch module."""
    dims = list(DIMS) + [num_classes]
    raw = {"eps": eps}
    keys = jax.random.split(key, 64)
    ki = 0
    for li in range(5):
        fan_in, fan_out = dims[li], dims[li + 1]
        # Stored as (in, out); PyTorch nn.Linear stores (out, in).
        w = jax.random.normal(keys[ki], (fan_in, fan_out), jnp.float32) / jnp.sqrt(fan_in); ki += 1
        b = 0.01 * jax.random.normal(keys[ki], (1, fan_out), jnp.float32); ki += 1
        raw[f"w{li}"] = w
        raw[f"b{li}"] = b
        if li < 4:  # BatchNorm1d after fc0..fc3 (eval-mode running stats)
            raw[f"gamma{li}"] = 1.0 + 0.1 * jax.random.normal(keys[ki], (1, fan_out), jnp.float32); ki += 1
            raw[f"beta{li}"] = 0.1 * jax.random.normal(keys[ki], (1, fan_out), jnp.float32); ki += 1
            raw[f"rmean{li}"] = 0.05 * jax.random.normal(keys[ki], (1, fan_out), jnp.float32); ki += 1
            raw[f"rvar{li}"] = 1.0 + 0.1 * jax.random.uniform(keys[ki], (1, fan_out), jnp.float32); ki += 1
    return raw


def fold_params(raw, num_classes):
    """One-time fold: BN(eval)+bias into weights, bf16 weights, padded fc4."""
    eps = raw["eps"]
    folded = {}
    for li in range(4):
        scale = raw[f"gamma{li}"] / jnp.sqrt(raw[f"rvar{li}"] + eps)   # (1, out)
        shift = raw[f"beta{li}"] - raw[f"rmean{li}"] * scale
        folded[f"w{li}"] = (raw[f"w{li}"] * scale).astype(jnp.bfloat16)
        folded[f"b{li}"] = (raw[f"b{li}"] * scale + shift).astype(jnp.float32)

    # Pad the classifier to a multiple of 128 output lanes (lane-dense store).
    c_pad = max(128, ((num_classes + 127) // 128) * 128)
    w4 = raw["w4"]
    w4p = jnp.zeros((w4.shape[0], c_pad), jnp.float32).at[:, :num_classes].set(w4)
    b4p = jnp.full((1, c_pad), NEG_LOGIT, jnp.float32).at[:, :num_classes].set(raw["b4"])
    folded["w4"] = w4p.astype(jnp.bfloat16)
    folded["b4"] = b4p                              # keep f32 (pad bias stays f32)
    return folded


def _select_batch_tile(batch):
    """Static (per-jit-trace) batch-tile choice.

    * B <= 8:        one tile of 8 rows (sublane minimum) -- no padded MXU work.
    * 9 <= B <= 128: split into two tiles so the 'parallel' grid axis can shard
                     across v7x's two TensorCores.
    * B > 128:       largest TB in {1024, 512, 256, 128} that still yields >= 2
                     grid steps (megacore) while amortizing per-step overhead
                     and giving full MXU M tiles; last tile may be partial
                     (Pallas masks it).
    """
    rup8 = lambda n: ((n + 7) // 8) * 8
    if batch <= 8:
        return 8
    if batch <= 128:
        return rup8((batch + 1) // 2)
    for tb in (1024, 512, 256, 128):
        if (batch + tb - 1) // tb >= 2:
            return tb
    return 128


@functools.partial(jax.jit, static_argnames=("num_classes",))
def mlp_forward(x_img, folded, num_classes):
    B = x_img.shape[0]
    # x.view(B, -1); cast straight to bf16 in one wrapper pass (no padded f32
    # copy written to / re-read from HBM).
    x = x_img.reshape(B, -1).astype(jnp.bfloat16)
    in_feats = x.shape[1]
    c_pad = folded["b4"].shape[1]

    TB = _select_batch_tile(B)
    grid = (pl.cdiv(B, TB),)
    # No jnp.pad: Pallas masks the partial last batch tile.  Every op in the
    # kernel is row-wise, so garbage rows in a partial input tile cannot
    # contaminate real rows, and their outputs are never stored.

    in_specs = [pl.BlockSpec((TB, in_feats), lambda i: (i, 0))]   # streamed x
    flat_params = []
    for li in range(5):
        w = folded[f"w{li}"]
        b = folded[f"b{li}"]
        # Constant index_map -> DMA'd once, resident in VMEM across the grid.
        in_specs.append(pl.BlockSpec(w.shape, lambda i: (0, 0)))
        in_specs.append(pl.BlockSpec(b.shape, lambda i: (0, 0)))
        flat_params += [w, b]

    rows = grid[0] * TB                               # rows actually computed
    dims = list(DIMS) + [c_pad]
    flops = 2 * rows * sum(dims[k] * dims[k + 1] for k in range(5))
    weight_bytes = sum(int(folded[f"w{k}"].size) * 2 + int(folded[f"b{k}"].size) * 4
                       for k in range(5))
    cost = pl.CostEstimate(
        flops=flops,
        transcendentals=rows * (c_pad + 1),           # exp + log in softmax
        bytes_accessed=weight_bytes + rows * in_feats * 2 + rows * c_pad * 4,
    )

    out = pl.pallas_call(
        mlp_kernel,
        out_shape=jax.ShapeDtypeStruct((B, c_pad), jnp.float32),
        grid=grid,
        in_specs=in_specs,
        out_specs=pl.BlockSpec((TB, c_pad), lambda i: (i, 0)),
        compiler_params=pltpu.CompilerParams(
            dimension_semantics=("parallel",),        # megacore-shardable
            vmem_limit_bytes=32 * 1024 * 1024,        # explicit for v5e; safe on v7x
        ),
        cost_estimate=cost,
    )(x, *flat_params)

    return out[:, :num_classes]


def mlp_forward_ref_f32(x_img, raw):
    """Pure-f32 JAX reference of the PyTorch eval forward."""
    eps = raw["eps"]
    B = x_img.shape[0]
    h = x_img.reshape(B, -1).astype(jnp.float32)
    for li in range(4):
        h = h @ raw[f"w{li}"] + raw[f"b{li}"]
        scale = raw[f"gamma{li}"] / jnp.sqrt(raw[f"rvar{li}"] + eps)
        shift = raw[f"beta{li}"] - raw[f"rmean{li}"] * scale
        h = jnp.maximum(h * scale + shift, 0.0)
    logits = h @ raw["w4"] + raw["b4"]
    return jax.nn.log_softmax(logits, axis=1)


def mlp_forward_ref_bf16(x_img, folded, num_classes):
    """Reference with the same folded/bf16 numerics as the kernel."""
    B = x_img.shape[0]
    h = x_img.reshape(B, -1).astype(jnp.bfloat16)
    for li in range(4):
        y = jnp.dot(h, folded[f"w{li}"], preferred_element_type=jnp.float32)
        h = jnp.maximum(y + folded[f"b{li}"], 0.0).astype(jnp.bfloat16)
    logits = jnp.dot(h, folded["w4"], preferred_element_type=jnp.float32) + folded["b4"]
    return jax.nn.log_softmax(logits, axis=1)[:, :num_classes]


if __name__ == "__main__":
    num_classes = 10

    key = jax.random.PRNGKey(0)
    k_params, k_x1, k_x2 = jax.random.split(key, 3)

    raw = make_params(k_params, num_classes)
    folded = fold_params(raw, num_classes)

    # MNIST-like input: (B, 1, 28, 28) -> flattened to (B, 784) in the wrapper.
    # Small-batch path (single 8-row tile, no padding).
    x_small = jax.random.normal(k_x1, (8, 1, 28, 28), jnp.float32)
    out_small = jax.block_until_ready(mlp_forward(x_small, folded, num_classes))
    assert out_small.shape == (8, num_classes)

    ref_bf16 = mlp_forward_ref_bf16(x_small, folded, num_classes)
    assert jnp.allclose(out_small, ref_bf16, atol=1e-4, rtol=1e-4), "mismatch vs bf16 reference (B=8)"
    ref_f32 = mlp_forward_ref_f32(x_small, raw)
    assert jnp.allclose(out_small, ref_f32, atol=1e-1, rtol=1e-1), "mismatch vs f32 reference (B=8)"

    # Multi-tile path (grid of 2, partial last tile) to exercise masking.
    x_mid = jax.random.normal(k_x2, (130, 1, 28, 28), jnp.float32)
    out_mid = jax.block_until_ready(mlp_forward(x_mid, folded, num_classes))
    assert out_mid.shape == (130, num_classes)
    ref_mid = mlp_forward_ref_bf16(x_mid, folded, num_classes)
    assert jnp.allclose(out_mid, ref_mid, atol=1e-4, rtol=1e-4), "mismatch vs bf16 reference (B=130)"
    assert bool(jnp.all(jnp.isfinite(out_mid))), "non-finite log-probs (B=130)"

    print("KERNEL_OK")
</pallas_src>

<mosaic_0001>
module attributes {stable_mosaic.version = 11 : i64} {
  func.func @mlp_kernel(%arg0: i32, %arg1: memref<8x784xbf16, #tpu.memory_space<vmem>>, %arg2: memref<784x512xbf16, #tpu.memory_space<vmem>>, %arg3: memref<1x512xf32, #tpu.memory_space<vmem>>, %arg4: memref<512x256xbf16, #tpu.memory_space<vmem>>, %arg5: memref<1x256xf32, #tpu.memory_space<vmem>>, %arg6: memref<256x128xbf16, #tpu.memory_space<vmem>>, %arg7: memref<1x128xf32, #tpu.memory_space<vmem>>, %arg8: memref<128x64xbf16, #tpu.memory_space<vmem>>, %arg9: memref<1x64xf32, #tpu.memory_space<vmem>>, %arg10: memref<64x128xbf16, #tpu.memory_space<vmem>>, %arg11: memref<1x128xf32, #tpu.memory_space<vmem>>, %arg12: memref<8x128xf32, #tpu.memory_space<vmem>>) attributes {dimension_semantics = [#tpu.dimension_semantics<parallel>], iteration_bounds = array<i64: 1>, scalar_prefetch = 0 : i64, scratch_operands = 0 : i64, tpu.core_type = #tpu.core_type<tc>, window_params = [{transform_indices = @transform_0, window_bounds = array<i64: 8, 784>}, {pipeline_mode = #tpu.pipeline_mode<synchronous>, transform_indices = @transform_1, window_bounds = array<i64: 784, 512>}, {pipeline_mode = #tpu.pipeline_mode<synchronous>, transform_indices = @transform_2, window_bounds = array<i64: 1, 512>}, {pipeline_mode = #tpu.pipeline_mode<synchronous>, transform_indices = @transform_3, window_bounds = array<i64: 512, 256>}, {pipeline_mode = #tpu.pipeline_mode<synchronous>, transform_indices = @transform_4, window_bounds = array<i64: 1, 256>}, {pipeline_mode = #tpu.pipeline_mode<synchronous>, transform_indices = @transform_5, window_bounds = array<i64: 256, 128>}, {pipeline_mode = #tpu.pipeline_mode<synchronous>, transform_indices = @transform_6, window_bounds = array<i64: 1, 128>}, {pipeline_mode = #tpu.pipeline_mode<synchronous>, transform_indices = @transform_7, window_bounds = array<i64: 128, 64>}, {pipeline_mode = #tpu.pipeline_mode<synchronous>, transform_indices = @transform_8, window_bounds = array<i64: 1, 64>}, {pipeline_mode = #tpu.pipeline_mode<synchronous>, transform_indices = @transform_9, window_bounds = array<i64: 64, 128>}, {pipeline_mode = #tpu.pipeline_mode<synchronous>, transform_indices = @transform_10, window_bounds = array<i64: 1, 128>}, {transform_indices = @transform_11, window_bounds = array<i64: 8, 128>}]} {
    %c0 = arith.constant 0 : index
    %c0_0 = arith.constant 0 : index
    %0 = vector.load %arg1[%c0, %c0_0] : memref<8x784xbf16, #tpu.memory_space<vmem>>, vector<8x784xbf16>
    %c0_1 = arith.constant 0 : index
    %c0_2 = arith.constant 0 : index
    %1 = vector.load %arg2[%c0_1, %c0_2] : memref<784x512xbf16, #tpu.memory_space<vmem>>, vector<784x512xbf16>
    %cst = arith.constant dense<0.000000e+00> : vector<8x512xf32>
    %2 = tpu.matmul %0, %1, %cst {dimension_numbers = #tpu.dot_dimension_numbers<[1], [0], [0], [1], [0, 0, 1, 1], [], []>} : vector<8x784xbf16>, vector<784x512xbf16>, vector<8x512xf32> -> vector<8x512xf32>
    %c0_3 = arith.constant 0 : index
    %c0_4 = arith.constant 0 : index
    %3 = vector.load %arg3[%c0_3, %c0_4] : memref<1x512xf32, #tpu.memory_space<vmem>>, vector<1x512xf32>
    %4 = vector.broadcast %3 : vector<1x512xf32> to vector<8x512xf32>
    %5 = arith.addf %2, %4 : vector<8x512xf32>
    %cst_5 = arith.constant 0.000000e+00 : f32
    %6 = vector.broadcast %cst_5 : f32 to vector<8x512xf32>
    %7 = arith.maximumf %5, %6 : vector<8x512xf32>
    %8 = arith.truncf %7 : vector<8x512xf32> to vector<8x512xbf16>
    %c0_6 = arith.constant 0 : index
    %c0_7 = arith.constant 0 : index
    %9 = vector.load %arg4[%c0_6, %c0_7] : memref<512x256xbf16, #tpu.memory_space<vmem>>, vector<512x256xbf16>
    %cst_8 = arith.constant dense<0.000000e+00> : vector<8x256xf32>
    %10 = tpu.matmul %8, %9, %cst_8 {dimension_numbers = #tpu.dot_dimension_numbers<[1], [0], [0], [1], [0, 0, 1, 1], [], []>} : vector<8x512xbf16>, vector<512x256xbf16>, vector<8x256xf32> -> vector<8x256xf32>
    %c0_9 = arith.constant 0 : index
    %c0_10 = arith.constant 0 : index
    %11 = vector.load %arg5[%c0_9, %c0_10] : memref<1x256xf32, #tpu.memory_space<vmem>>, vector<1x256xf32>
    %12 = vector.broadcast %11 : vector<1x256xf32> to vector<8x256xf32>
    %13 = arith.addf %10, %12 : vector<8x256xf32>
    %cst_11 = arith.constant 0.000000e+00 : f32
    %14 = vector.broadcast %cst_11 : f32 to vector<8x256xf32>
    %15 = arith.maximumf %13, %14 : vector<8x256xf32>
    %16 = arith.truncf %15 : vector<8x256xf32> to vector<8x256xbf16>
    %c0_12 = arith.constant 0 : index
    %c0_13 = arith.constant 0 : index
    %17 = vector.load %arg6[%c0_12, %c0_13] : memref<256x128xbf16, #tpu.memory_space<vmem>>, vector<256x128xbf16>
    %cst_14 = arith.constant dense<0.000000e+00> : vector<8x128xf32>
    %18 = tpu.matmul %16, %17, %cst_14 {dimension_numbers = #tpu.dot_dimension_numbers<[1], [0], [0], [1], [0, 0, 1, 1], [], []>} : vector<8x256xbf16>, vector<256x128xbf16>, vector<8x128xf32> -> vector<8x128xf32>
    %c0_15 = arith.constant 0 : index
    %c0_16 = arith.constant 0 : index
    %19 = vector.load %arg7[%c0_15, %c0_16] : memref<1x128xf32, #tpu.memory_space<vmem>>, vector<1x128xf32>
    %20 = vector.broadcast %19 : vector<1x128xf32> to vector<8x128xf32>
    %21 = arith.addf %18, %20 : vector<8x128xf32>
    %cst_17 = arith.constant 0.000000e+00 : f32
    %22 = vector.broadcast %cst_17 : f32 to vector<8x128xf32>
    %23 = arith.maximumf %21, %22 : vector<8x128xf32>
    %24 = arith.truncf %23 : vector<8x128xf32> to vector<8x128xbf16>
    %c0_18 = arith.constant 0 : index
    %c0_19 = arith.constant 0 : index
    %25 = vector.load %arg8[%c0_18, %c0_19] : memref<128x64xbf16, #tpu.memory_space<vmem>>, vector<128x64xbf16>
    %cst_20 = arith.constant dense<0.000000e+00> : vector<8x64xf32>
    %26 = tpu.matmul %24, %25, %cst_20 {dimension_numbers = #tpu.dot_dimension_numbers<[1], [0], [0], [1], [0, 0, 1, 1], [], []>} : vector<8x128xbf16>, vector<128x64xbf16>, vector<8x64xf32> -> vector<8x64xf32>
    %c0_21 = arith.constant 0 : index
    %c0_22 = arith.constant 0 : index
    %27 = vector.load %arg9[%c0_21, %c0_22] : memref<1x64xf32, #tpu.memory_space<vmem>>, vector<1x64xf32>
    %28 = vector.broadcast %27 : vector<1x64xf32> to vector<8x64xf32>
    %29 = arith.addf %26, %28 : vector<8x64xf32>
    %cst_23 = arith.constant 0.000000e+00 : f32
    %30 = vector.broadcast %cst_23 : f32 to vector<8x64xf32>
    %31 = arith.maximumf %29, %30 : vector<8x64xf32>
    %32 = arith.truncf %31 : vector<8x64xf32> to vector<8x64xbf16>
    %c0_24 = arith.constant 0 : index
    %c0_25 = arith.constant 0 : index
    %33 = vector.load %arg10[%c0_24, %c0_25] : memref<64x128xbf16, #tpu.memory_space<vmem>>, vector<64x128xbf16>
    %cst_26 = arith.constant dense<0.000000e+00> : vector<8x128xf32>
    %34 = tpu.matmul %32, %33, %cst_26 {dimension_numbers = #tpu.dot_dimension_numbers<[1], [0], [0], [1], [0, 0, 1, 1], [], []>} : vector<8x64xbf16>, vector<64x128xbf16>, vector<8x128xf32> -> vector<8x128xf32>
    %c0_27 = arith.constant 0 : index
    %c0_28 = arith.constant 0 : index
    %35 = vector.load %arg11[%c0_27, %c0_28] : memref<1x128xf32, #tpu.memory_space<vmem>>, vector<1x128xf32>
    %36 = vector.broadcast %35 : vector<1x128xf32> to vector<8x128xf32>
    %37 = arith.addf %34, %36 : vector<8x128xf32>
    %cst_29 = arith.constant dense<0xFF800000> : vector<8xf32>
    %38 = vector.multi_reduction <maximumf>, %37, %cst_29 [1] : vector<8x128xf32> to vector<8xf32>
    %39 = vector.shape_cast %38 : vector<8xf32> to vector<8x1xf32>
    %40 = vector.broadcast %39 : vector<8x1xf32> to vector<8x128xf32>
    %41 = arith.subf %37, %40 : vector<8x128xf32>
    %42 = math.exp %41 : vector<8x128xf32>
    %cst_30 = arith.constant dense<0.000000e+00> : vector<8xf32>
    %43 = vector.multi_reduction <add>, %42, %cst_30 [1] : vector<8x128xf32> to vector<8xf32>
    %44 = vector.shape_cast %43 : vector<8xf32> to vector<8x1xf32>
    %45 = math.log %44 : vector<8x1xf32>
    %46 = vector.broadcast %45 : vector<8x1xf32> to vector<8x128xf32>
    %47 = arith.subf %41, %46 : vector<8x128xf32>
    %c0_31 = arith.constant 0 : index
    %c0_32 = arith.constant 0 : index
    %48 = vector.load %arg12[%c0_31, %c0_32] : memref<8x128xf32, #tpu.memory_space<vmem>>, vector<8x128xf32>
    tpu.vector_store %arg12[%c0_31, %c0_32], %47 {strides = array<i32>} : memref<8x128xf32, #tpu.memory_space<vmem>>, vector<8x128xf32>,
    return
  }
  func.func @transform_0(%arg0: i32) -> (i32, i32) {
    %c0_i32 = arith.constant 0 : i32
    %c0_i32_0 = arith.constant 0 : i32
    return %arg0, %c0_i32 : i32, i32
  }
  func.func @transform_1(%arg0: i32) -> (i32, i32) {
    %c0_i32 = arith.constant 0 : i32
    %c0_i32_0 = arith.constant 0 : i32
    %c0_i32_1 = arith.constant 0 : i32
    return %c0_i32, %c0_i32_0 : i32, i32
  }
  func.func @transform_2(%arg0: i32) -> (i32, i32) {
    %c0_i32 = arith.constant 0 : i32
    %c0_i32_0 = arith.constant 0 : i32
    %c0_i32_1 = arith.constant 0 : i32
    return %c0_i32, %c0_i32_0 : i32, i32
  }
  func.func @transform_3(%arg0: i32) -> (i32, i32) {
    %c0_i32 = arith.constant 0 : i32
    %c0_i32_0 = arith.constant 0 : i32
    %c0_i32_1 = arith.constant 0 : i32
    return %c0_i32, %c0_i32_0 : i32, i32
  }
  func.func @transform_4(%arg0: i32) -> (i32, i32) {
    %c0_i32 = arith.constant 0 : i32
    %c0_i32_0 = arith.constant 0 : i32
    %c0_i32_1 = arith.constant 0 : i32
    return %c0_i32, %c0_i32_0 : i32, i32
  }
  func.func @transform_5(%arg0: i32) -> (i32, i32) {
    %c0_i32 = arith.constant 0 : i32
    %c0_i32_0 = arith.constant 0 : i32
    %c0_i32_1 = arith.constant 0 : i32
    return %c0_i32, %c0_i32_0 : i32, i32
  }
  func.func @transform_6(%arg0: i32) -> (i32, i32) {
    %c0_i32 = arith.constant 0 : i32
    %c0_i32_0 = arith.constant 0 : i32
    %c0_i32_1 = arith.constant 0 : i32
    return %c0_i32, %c0_i32_0 : i32, i32
  }
  func.func @transform_7(%arg0: i32) -> (i32, i32) {
    %c0_i32 = arith.constant 0 : i32
    %c0_i32_0 = arith.constant 0 : i32
    %c0_i32_1 = arith.constant 0 : i32
    return %c0_i32, %c0_i32_0 : i32, i32
  }
  func.func @transform_8(%arg0: i32) -> (i32, i32) {
    %c0_i32 = arith.constant 0 : i32
    %c0_i32_0 = arith.constant 0 : i32
    %c0_i32_1 = arith.constant 0 : i32
    return %c0_i32, %c0_i32_0 : i32, i32
  }
  func.func @transform_9(%arg0: i32) -> (i32, i32) {
    %c0_i32 = arith.constant 0 : i32
    %c0_i32_0 = arith.constant 0 : i32
    %c0_i32_1 = arith.constant 0 : i32
    return %c0_i32, %c0_i32_0 : i32, i32
  }
  func.func @transform_10(%arg0: i32) -> (i32, i32) {
    %c0_i32 = arith.constant 0 : i32
    %c0_i32_0 = arith.constant 0 : i32
    %c0_i32_1 = arith.constant 0 : i32
    return %c0_i32, %c0_i32_0 : i32, i32
  }
  func.func @transform_11(%arg0: i32) -> (i32, i32) {
    %c0_i32 = arith.constant 0 : i32
    %c0_i32_0 = arith.constant 0 : i32
    return %arg0, %c0_i32 : i32, i32
  }
}

</mosaic_0001>

<bundles_post_ra>
// kernel: mlp_forward.1
= control target key start
LH: loop header
LB: loop body
LE: loop exit
PB: predicated region body
PF: predicated region fallthrough
CT: control target
= control target key end

     0   :  { %16 = vsyncpa [#allocation3], 0  ;;  %s3835_s0 = inlined_call_operand.vmem [shape: bf16[8,784], index: 0, kind: input, shape index: {}]   ;;  %s3836_s1 = inlined_call_operand.hbm [shape: bf16[784,512], index: 1, kind: input, shape index: {}]   ;;  %s3837_s2 = inlined_call_operand.vmem [shape: f32[1,512], index: 2, kind: input, shape index: {}]   ;;  %s3838_s3 = inlined_call_operand.vmem [shape: bf16[512,256], index: 3, kind: input, shape index: {}]   ;;  %s3839_s4 = inlined_call_operand.vmem [shape: f32[1,256], index: 4, kind: input, shape index: {}]   ;;  %s3840_s5 = inlined_call_operand.hbm [shape: bf16[256,128], index: 5, kind: input, shape index: {}]   ;;  %s3841_s6 = inlined_call_operand.vmem [shape: f32[1,128], index: 6, kind: input, shape index: {}]   ;;  %s3842_s7 = inlined_call_operand.vmem [shape: bf16[128,64], index: 7, kind: input, shape index: {}]   ;;  %s3843_s8 = inlined_call_operand.vmem [shape: f32[1,64], index: 8, kind: input, shape index: {}]   ;;  %s3844_s9 = inlined_call_operand.vmem [shape: bf16[64,128], index: 9, kind: input, shape index: {}]   ;;  %s3845_s10 = inlined_call_operand.vmem [shape: f32[1,128], index: 10, kind: input, shape index: {}]   ;;  %s3846_s11 = inlined_call_operand.hbm [shape: f32[8,128], index: 11, kind: output, shape index: {}]  }
   0x1   :  { %17 = vsyncpa [#allocation6], 0 }
   0x2   :  { %18 = vsyncpa [#allocation4], 0  ;;  %s3429_s17 = smov [#allocation2]   ;;  %s3357_s21 = scalar_lea.hbm %s3836_s1, 25088 }
   0x3   :  { %s26_s18 = sshll.u32 %s3429_s17, 4  ;;  %p3358_p0 = scmp.ne.s32.totalorder %s3836_s1, %s3357_s21  ;;  %s27_s18 = int_to_ptr.vmem [resolvable:$true] %s26_s18 }
   0x4   :  { %p3361_p1 = scmp.lt.u32.totalorder %s3357_s21, %s3836_s1 }
   0x6   :  { %p3363_p2 = pnand %p3361_p1, %p3358_p0 }
   0x8   :  { %3366 = shalt.err (!%p3363_p2)
}
   0x9   :  { %s3367_s26 = scalar_lea.vmem %s27_s18, 25088  ;;  %p3372_p4 = scmp.lt.s32.totalorder %s27_s18, %s27_s18 }
   0xa   :  { %p3368_p3 = scmp.ne.s32.totalorder %s27_s18, %s3367_s26  ;;  %p3373_p5 = scmp.lt.s32.totalorder %s3367_s26, %s3367_s26 }
   0xc   :  { %p3374_p6 = por %p3373_p5, %p3372_p4 }
   0xe   :  { %p3375_p7 = pnand %p3374_p6, %p3368_p3 }
  0x10   :  { %3378 = shalt.err (!%p3375_p7)
}
  0x11   :  { %s3430_s27 = smov 256   ;;  %s3431_s28 = smov 16  }
  0x12   :  { %32 = dma.hbm_to_vmem [thread:$0]  %s3836_s1, 25088, %s27_s18, [#allocation3], %s3430_s27, %s3430_s27, %s3431_s28  }
  0x13   :  { %s3432_s12 = smov [#allocation5]   ;;  %s3379_s16 = scalar_lea.hbm %s3840_s5, 2048 }
  0x14   :  { %s44_s13 = sshll.u32 %s3432_s12, 4  ;;  %p3380_p8 = scmp.ne.s32.totalorder %s3840_s5, %s3379_s16  ;;  %s45_s13 = int_to_ptr.vmem [resolvable:$true] %s44_s13 }
  0x15   :  { %p3383_p9 = scmp.lt.u32.totalorder %s3379_s16, %s3840_s5 }
  0x17   :  { %p3385_p10 = pnand %p3383_p9, %p3380_p8 }
  0x19   :  { %3388 = shalt.err (!%p3385_p10)
}
  0x1a   :  { %s3389_s22 = scalar_lea.vmem %s45_s13, 2048  ;;  %p3394_p12 = scmp.lt.s32.totalorder %s45_s13, %s45_s13 }
  0x1b   :  { %p3390_p11 = scmp.ne.s32.totalorder %s45_s13, %s3389_s22  ;;  %p3395_p13 = scmp.lt.s32.totalorder %s3389_s22, %s3389_s22 }
  0x1d   :  { %p3396_p0 = por %p3395_p13, %p3394_p12 }
  0x1f   :  { %p3397_p1 = pnand %p3396_p0, %p3390_p11 }
  0x21   :  { %3400 = shalt.err (!%p3397_p1)
}
  0x22   :  { %s3433_s1 = smov 64   ;;  %s3434_s18 = smov 4  }
  0x23   :  { %50 = dma.hbm_to_vmem [thread:$0]  %s3840_s5, 2048, %s45_s13, [#allocation6], %s3433_s1, %s3433_s1, %s3434_s18  }
  0x24   :  { %3423 = dma.done.wait [#allocation3], 25088  }
  0x25   :  { %3424 = vsyncadd [#allocation3], 4294942208 }
  0x26   :  { %3425 = dma.done.wait [#allocation6], 2048  }
  0x27   :  { %3426 = vsyncadd [#allocation6], 4294965248  ;;  %v3435_v0 = vmov 0   ;;  %v2927_v1 = vld [vmem:[#allocation2 + $0x4] ss:$16 sps:$4 sm:$0xff]   ;;  %vm1294_vm0 = vcmask 130048  }
  0x28   :  { %1453 = vmatprep.mubr.bf16.mxu1 %v3435_v0  ;;  %v2929_v2 = vld [vmem:[#allocation2 + $0x604] ss:$16 sps:$4 sm:$0xff]   ;;  %1298 = vmatprep.subr.bf16.mxu0 %v2927_v1  ;;  %v2931_v3 = vld [vmem:[#allocation2] ss:$16 sps:$4 sm:$0xff]   ;;  %v2935_v6 = vld [vmem:[#allocation2 + $0x8] ss:$16 sps:$4 sm:$0xff]  }
  0x29   :  { %v2932_v4 = vld [vmem:[#allocation2 + $0x600] ss:$16 sps:$4 sm:$0xff]   ;;  %1421 = vmatprep.subr.bf16.mxu1 %v2929_v2  ;;  %v2933_v5 = vld [vmem:[#allocation2 + $0x24] ss:$16 sps:$4 sm:$0xff]   ;;  %1299 = vmatpush1.bf16.msra.mxu0 %v2931_v3  ;;  %v2937_v7 = vld [vmem:[#allocation2 + $0xc] ss:$16 sps:$4 sm:$0xff]  }
  0x2a   :  { %1422 = vmatpush1.bf16.msra.mxu1 %v2932_v4  ;;  %1300 = vmatprep.subr.bf16.mxu0 %v2933_v5  ;;  %v2938_v8 = vld [vmem:[#allocation2 + $0x20] ss:$16 sps:$4 sm:$0xff]   ;;  %v2939_v9 = vld [vmem:[%s3835_s0 + $0x18] ss:$0 sps:$4 sm:$0xff]   ;;  %v2940_v10 = vld [vmem:[#allocation2 + $0x44] ss:$16 sps:$4 sm:$0xff]  }
  0x2b   :  { %1462 = vmatprep.subr.bf16.mxu1 %v2937_v7  ;;  %v2942_v11 = vld [vmem:[#allocation2 + $0x28] ss:$16 sps:$4 sm:$0xff]   ;;  %v2944_v12 = vld [vmem:[#allocation2 + $0x2c] ss:$16 sps:$4 sm:$0xff]   ;;  %v2945_v13 = vld [vmem:[#allocation2 + $0x40] ss:$16 sps:$4 sm:$0xff]  }
  0x2c   :  { %v2946_v14 = vld [vmem:[#allocation2 + $0x64] ss:$16 sps:$4 sm:$0xff]   ;;  %v2950_v15 = vld [vmem:[#allocation2 + $0x4c] ss:$16 sps:$4 sm:$0xff]   ;;  %v2948_v16 = vld [vmem:[#allocation2 + $0x48] ss:$16 sps:$4 sm:$0xff]  }
  0x2d   :  { %2719 = vmatmul.mubr.msk.bf16.vlgmr.msra.gmra.mrb[0].mxu1 %vm1294_vm0, %v2939_v9  ;;  %1301 = vmatpush1.bf16.msra.mxu0 %v2938_v8  ;;  %v2951_v17 = vld [vmem:[#allocation2 + $0x60] ss:$16 sps:$4 sm:$0xff]   ;;  %v2952_v18 = vld [vmem:[#allocation2 + $0x84] ss:$16 sps:$4 sm:$0xff]   ;;  %v2956_v19 = vld [vmem:[#allocation2 + $0x6c] ss:$16 sps:$4 sm:$0xff]  }
  0x2e   :  { %1463 = vmatpush1.bf16.msra.mxu1 %v2935_v6  ;;  %1302 = vmatprep.subr.bf16.mxu0 %v2940_v10  ;;  %v2954_v20 = vld [vmem:[#allocation2 + $0x68] ss:$16 sps:$4 sm:$0xff]   ;;  %v2957_v21 = vld [vmem:[#allocation2 + $0x80] ss:$16 sps:$4 sm:$0xff]   ;;  %v2958_v22 = vld [vmem:[#allocation2 + $0xa4] ss:$16 sps:$4 sm:$0xff]  }
  0x2f   :  { %1464 = vmatprep.subr.bf16.mxu1 %v2944_v12  ;;  %v2962_v23 = vld [vmem:[#allocation2 + $0x8c] ss:$16 sps:$4 sm:$0xff]   ;;  %v2960_v24 = vld [vmem:[#allocation2 + $0x88] ss:$16 sps:$4 sm:$0xff]   ;;  %v2963_v25 = vld [vmem:[#allocation2 + $0xa0] ss:$16 sps:$4 sm:$0xff]  }
  0x30   :  { %v2964_v26 = vld [vmem:[#allocation2 + $0xc4] ss:$16 sps:$4 sm:$0xff]   ;;  %v2968_v27 = vld [vmem:[#allocation2 + $0xac] ss:$16 sps:$4 sm:$0xff]   ;;  %v2966_v28 = vld [vmem:[#allocation2 + $0xa8] ss:$16 sps:$4 sm:$0xff]  }
  0x31   :  { %1303 = vmatpush1.bf16.msra.mxu0 %v2945_v13  ;;  %v2969_v29 = vld [vmem:[#allocation2 + $0xc0] ss:$16 sps:$4 sm:$0xff]   ;;  %v2970_v30 = vld [vmem:[#allocation2 + $0xe4] ss:$16 sps:$4 sm:$0xff]   ;;  %v2974_v31 = vld [vmem:[#allocation2 + $0xcc] ss:$16 sps:$4 sm:$0xff]  }
  0x32   :  { %1465 = vmatpush1.bf16.msra.mxu1 %v2942_v11  ;;  %1304 = vmatprep.subr.bf16.mxu0 %v2946_v14  ;;  %v2972_v32 = vld [vmem:[#allocation2 + $0xc8] ss:$16 sps:$4 sm:$0xff]   ;;  %v2975_v33 = vld [vmem:[#allocation2 + $0xe0] ss:$16 sps:$4 sm:$0xff]   ;;  %v2976_v34 = vld [vmem:[#allocation2 + $0x104] ss:$16 sps:$4 sm:$0xff]  }
  0x33   :  { %1466 = vmatprep.subr.bf16.mxu1 %v2950_v15  ;;  %v2980_v35 = vld [vmem:[#allocation2 + $0xec] ss:$16 sps:$4 sm:$0xff]   ;;  %v2978_v36 = vld [vmem:[#allocation2 + $0xe8] ss:$16 sps:$4 sm:$0xff]   ;;  %v2981_v37 = vld [vmem:[#allocation2 + $0x100] ss:$16 sps:$4 sm:$0xff]  }
  0x34   :  { %v2982_v38 = vld [vmem:[#allocation2 + $0x124] ss:$16 sps:$4 sm:$0xff]   ;;  %v2986_v39 = vld [vmem:[#allocation2 + $0x10c] ss:$16 sps:$4 sm:$0xff]   ;;  %v2984_v40 = vld [vmem:[#allocation2 + $0x108] ss:$16 sps:$4 sm:$0xff]  }
  0x35   :  { %1305 = vmatpush1.bf16.msra.mxu0 %v2951_v17  ;;  %v2987_v41 = vld [vmem:[#allocation2 + $0x120] ss:$16 sps:$4 sm:$0xff]   ;;  %v2988_v42 = vld [vmem:[#allocation2 + $0x144] ss:$16 sps:$4 sm:$0xff]   ;;  %v2992_v43 = vld [vmem:[#allocation2 + $0x12c] ss:$16 sps:$4 sm:$0xff]  }
  0x36   :  { %1467 = vmatpush1.bf16.msra.mxu1 %v2948_v16  ;;  %1306 = vmatprep.subr.bf16.mxu0 %v2952_v18  ;;  %v2990_v44 = vld [vmem:[#allocation2 + $0x128] ss:$16 sps:$4 sm:$0xff]   ;;  %v2993_v45 = vld [vmem:[#allocation2 + $0x140] ss:$16 sps:$4 sm:$0xff]   ;;  %v2994_v46 = vld [vmem:[#allocation2 + $0x164] ss:$16 sps:$4 sm:$0xff]  }
  0x37   :  { %1468 = vmatprep.subr.bf16.mxu1 %v2956_v19  ;;  %v2998_v47 = vld [vmem:[#allocation2 + $0x14c] ss:$16 sps:$4 sm:$0xff]   ;;  %v2996_v48 = vld [vmem:[#allocation2 + $0x148] ss:$16 sps:$4 sm:$0xff]   ;;  %v68_v49 = vld [vmem:[%s3835_s0] sm:$0xff]  ;;  %vm3437_vm1 = vmmov 0  }
  0x38   :  { %v2999_v50 = vld [vmem:[#allocation2 + $0x160] ss:$16 sps:$4 sm:$0xff]   ;;  %v3000_v51 = vld [vmem:[#allocation2 + $0x184] ss:$16 sps:$4 sm:$0xff]   ;;  %v2517_v52 = vcombine.high %v68_v49, %v68_v49  ;;  %v3004_v53 = vld [vmem:[#allocation2 + $0x16c] ss:$16 sps:$4 sm:$0xff]   ;;  %v2516_v7 = vcombine.low %v68_v49, %v68_v49 }
  0x39   :  { %1307 = vmatpush1.bf16.msra.mxu0 %v2957_v21  ;;  %v3002_v54 = vld [vmem:[#allocation2 + $0x168] ss:$16 sps:$4 sm:$0xff]   ;;  %v3005_v55 = vld [vmem:[#allocation2 + $0x180] ss:$16 sps:$4 sm:$0xff]   ;;  %v3006_v56 = vld [vmem:[#allocation2 + $0x1a4] ss:$16 sps:$4 sm:$0xff]  }
  0x3a   :  { %1469 = vmatpush1.bf16.msra.mxu1 %v2954_v20  ;;  %1308 = vmatprep.subr.bf16.mxu0 %v2958_v22  ;;  %v3010_v57 = vld [vmem:[#allocation2 + $0x18c] ss:$16 sps:$4 sm:$0xff]   ;;  %v3008_v58 = vld [vmem:[#allocation2 + $0x188] ss:$16 sps:$4 sm:$0xff]   ;;  %v3011_v59 = vld [vmem:[#allocation2 + $0x1a0] ss:$16 sps:$4 sm:$0xff]  }
  0x3b   :  { %1470 = vmatprep.subr.bf16.mxu1 %v2962_v23  ;;  %1330 = vmatprep.mubr.bf16.mxu0 %v2517_v52  ;;  %v3012_v60 = vld [vmem:[#allocation2 + $0x1c4] ss:$16 sps:$4 sm:$0xff]   ;;  %v3016_v61 = vld [vmem:[#allocation2 + $0x1ac] ss:$16 sps:$4 sm:$0xff]   ;;  %v3014_v62 = vld [vmem:[#allocation2 + $0x1a8] ss:$16 sps:$4 sm:$0xff]  }
  0x3c   :  { %1494 = vmatprep.mubr.bf16.mxu1 %v2517_v52  ;;  %v3017_v63 = vld [vmem:[#allocation2 + $0x1c0] ss:$16 sps:$4 sm:$0xff]   ;;  %v3018_v1 = vld [vmem:[#allocation2 + $0x1e4] ss:$16 sps:$4 sm:$0xff]   ;;  %v3022_v2 = vld [vmem:[#allocation2 + $0x1cc] ss:$16 sps:$4 sm:$0xff]  }
  0x3d   :  { %1309 = vmatpush1.bf16.msra.mxu0 %v2963_v25  ;;  %v3020_v3 = vld [vmem:[#allocation2 + $0x1c8] ss:$16 sps:$4 sm:$0xff]   ;;  %v3023_v4 = vld [vmem:[#allocation2 + $0x1e0] ss:$16 sps:$4 sm:$0xff]   ;;  %v3028_v5 = vld [vmem:[#allocation2 + $0x204] ss:$16 sps:$4 sm:$0xff]  }
  0x3e   :  { %1471 = vmatpush1.bf16.msra.mxu1 %v2960_v24  ;;  %1310 = vmatprep.subr.bf16.mxu0 %v2964_v26  ;;  %v3031_v6 = vld [vmem:[#allocation2 + $0x1ec] ss:$16 sps:$4 sm:$0xff]   ;;  %v3026_v8 = vld [vmem:[#allocation2 + $0x200] ss:$16 sps:$4 sm:$0xff]   ;;  %v3029_v9 = vld [vmem:[#allocation2 + $0x1e8] ss:$16 sps:$4 sm:$0xff]  }
  0x3f   :  { %1472 = vmatprep.subr.bf16.mxu1 %v2968_v27  ;;  %v3034_v10 = vld [vmem:[#allocation2 + $0x224] ss:$16 sps:$4 sm:$0xff]   ;;  %v3037_v11 = vld [vmem:[#allocation2 + $0x20c] ss:$16 sps:$4 sm:$0xff]   ;;  %v3032_v12 = vld [vmem:[#allocation2 + $0x220] ss:$16 sps:$4 sm:$0xff]  }
  0x40   :  { %v3035_v13 = vld [vmem:[#allocation2 + $0x208] ss:$16 sps:$4 sm:$0xff]   ;;  %v3040_v14 = vld [vmem:[#allocation2 + $0x244] ss:$16 sps:$4 sm:$0xff]   ;;  %v3043_v15 = vld [vmem:[#allocation2 + $0x22c] ss:$16 sps:$4 sm:$0xff]  }
  0x41   :  { %1311 = vmatpush1.bf16.msra.mxu0 %v2969_v29  ;;  %v3038_v16 = vld [vmem:[#allocation2 + $0x240] ss:$16 sps:$4 sm:$0xff]   ;;  %v3041_v17 = vld [vmem:[#allocation2 + $0x228] ss:$16 sps:$4 sm:$0xff]   ;;  %v3046_v18 = vld [vmem:[#allocation2 + $0x264] ss:$16 sps:$4 sm:$0xff]  }
  0x42   :  { %1473 = vmatpush1.bf16.msra.mxu1 %v2966_v28  ;;  %1312 = vmatprep.subr.bf16.mxu0 %v2970_v30  ;;  %v3049_v19 = vld [vmem:[#allocation2 + $0x24c] ss:$16 sps:$4 sm:$0xff]   ;;  %v3044_v20 = vld [vmem:[#allocation2 + $0x260] ss:$16 sps:$4 sm:$0xff]   ;;  %v3047_v21 = vld [vmem:[#allocation2 + $0x248] ss:$16 sps:$4 sm:$0xff]  }
  0x43   :  { %1474 = vmatprep.subr.bf16.mxu1 %v2974_v31  ;;  %v3052_v22 = vld [vmem:[#allocation2 + $0x284] ss:$16 sps:$4 sm:$0xff]   ;;  %v3055_v23 = vld [vmem:[#allocation2 + $0x26c] ss:$16 sps:$4 sm:$0xff]   ;;  %v3050_v24 = vld [vmem:[#allocation2 + $0x280] ss:$16 sps:$4 sm:$0xff]  }
  0x44   :  { %v3053_v25 = vld [vmem:[#allocation2 + $0x268] ss:$16 sps:$4 sm:$0xff]   ;;  %v3058_v26 = vld [vmem:[#allocation2 + $0x2a4] ss:$16 sps:$4 sm:$0xff]   ;;  %v3061_v27 = vld [vmem:[#allocation2 + $0x28c] ss:$16 sps:$4 sm:$0xff]  }
  0x45   :  { %1313 = vmatpush1.bf16.msra.mxu0 %v2975_v33  ;;  %v3056_v28 = vld [vmem:[#allocation2 + $0x2a0] ss:$16 sps:$4 sm:$0xff]   ;;  %v3059_v29 = vld [vmem:[#allocation2 + $0x288] ss:$16 sps:$4 sm:$0xff]   ;;  %v3064_v30 = vld [vmem:[#allocation2 + $0x2c4] ss:$16 sps:$4 sm:$0xff]  }
  0x46   :  { %1475 = vmatpush1.bf16.msra.mxu1 %v2972_v32  ;;  %1314 = vmatprep.subr.bf16.mxu0 %v2976_v34  ;;  %v3067_v31 = vld [vmem:[#allocation2 + $0x2ac] ss:$16 sps:$4 sm:$0xff]   ;;  %v3062_v33 = vld [vmem:[#allocation2 + $0x2c0] ss:$16 sps:$4 sm:$0xff]   ;;  %v3065_v34 = vld [vmem:[#allocation2 + $0x2a8] ss:$16 sps:$4 sm:$0xff]  }
  0x47   :  { %1476 = vmatprep.subr.bf16.mxu1 %v2980_v35  ;;  %v3534_v32 = vld [vmem:[%s3835_s0 + $0x8] sm:$0xff]  ;;  %v3094_v52 = vld [vmem:[#allocation2 + $0x364] ss:$16 sps:$4 sm:$0xff]   ;;  %vm2445_vm2 = vcmask 523264  }
  0x48   :  { %v2519_v35 = vcombine.high %v3534_v32, %v3534_v32  ;;  %v3091_v49 = vld [vmem:[#allocation2 + $0x32c] ss:$16 sps:$4 sm:$0xff]  }
  0x49   :  { %1315 = vmatpush1.bf16.msra.mxu0 %v2981_v37  ;;  %v3073_v37 = vld [vmem:[#allocation2 + $0x2cc] ss:$16 sps:$4 sm:$0xff]  }
  0x4a   :  { %1477 = vmatpush1.bf16.msra.mxu1 %v2978_v36  ;;  %1316 = vmatprep.subr.bf16.mxu0 %v2982_v38  ;;  %v3070_v36 = vld [vmem:[#allocation2 + $0x2e4] ss:$16 sps:$4 sm:$0xff]   ;;  %v3068_v38 = vld [vmem:[#allocation2 + $0x2e0] ss:$16 sps:$4 sm:$0xff]  }
  0x4b   :  { %1478 = vmatprep.subr.bf16.mxu1 %v2986_v39  ;;  %v3071_v39 = vld [vmem:[#allocation2 + $0x2c8] ss:$16 sps:$4 sm:$0xff]  }
  0x4d   :  { %1317 = vmatpush1.bf16.msra.mxu0 %v2987_v41  ;;  %v3079_v41 = vld [vmem:[#allocation2 + $0x2ec] ss:$16 sps:$4 sm:$0xff]  }
  0x4e   :  { %1479 = vmatpush1.bf16.msra.mxu1 %v2984_v40  ;;  %1318 = vmatprep.subr.bf16.mxu0 %v2988_v42  ;;  %v3076_v40 = vld [vmem:[#allocation2 + $0x304] ss:$16 sps:$4 sm:$0xff]   ;;  %v3074_v42 = vld [vmem:[#allocation2 + $0x300] ss:$16 sps:$4 sm:$0xff]  }
  0x4f   :  { %1480 = vmatprep.subr.bf16.mxu1 %v2992_v43  ;;  %v3077_v43 = vld [vmem:[#allocation2 + $0x2e8] ss:$16 sps:$4 sm:$0xff]  }
  0x51   :  { %1319 = vmatpush1.bf16.msra.mxu0 %v2993_v45  ;;  %v3085_v45 = vld [vmem:[#allocation2 + $0x30c] ss:$16 sps:$4 sm:$0xff]  }
  0x52   :  { %1481 = vmatpush1.bf16.msra.mxu1 %v2990_v44  ;;  %1320 = vmatprep.subr.bf16.mxu0 %v2994_v46  ;;  %v3082_v44 = vld [vmem:[#allocation2 + $0x324] ss:$16 sps:$4 sm:$0xff]   ;;  %v3080_v46 = vld [vmem:[#allocation2 + $0x320] ss:$16 sps:$4 sm:$0xff]  }
  0x53   :  { %1482 = vmatprep.subr.bf16.mxu1 %v2998_v47  ;;  %v3083_v47 = vld [vmem:[#allocation2 + $0x308] ss:$16 sps:$4 sm:$0xff]  }
  0x55   :  { %1321 = vmatpush1.bf16.msra.mxu0 %v2999_v50  ;;  %v3086_v50 = vld [vmem:[#allocation2 + $0x340] ss:$16 sps:$4 sm:$0xff]  }
  0x56   :  { %1483 = vmatpush1.bf16.msra.mxu1 %v2996_v48  ;;  %1322 = vmatprep.subr.bf16.mxu0 %v3000_v51  ;;  %v3088_v48 = vld [vmem:[#allocation2 + $0x344] ss:$16 sps:$4 sm:$0xff]   ;;  %v3089_v51 = vld [vmem:[#allocation2 + $0x328] ss:$16 sps:$4 sm:$0xff]  }
  0x57   :  { %1484 = vmatprep.subr.bf16.mxu1 %v3004_v53  ;;  %v3097_v53 = vld [vmem:[#allocation2 + $0x34c] ss:$16 sps:$4 sm:$0xff]  }
  0x59   :  { %1323 = vmatpush1.bf16.msra.mxu0 %v3005_v55  ;;  %v3095_v55 = vld [vmem:[#allocation2 + $0x348] ss:$16 sps:$4 sm:$0xff]  }
  0x5a   :  { %1485 = vmatpush1.bf16.msra.mxu1 %v3002_v54  ;;  %1324 = vmatprep.subr.bf16.mxu0 %v3006_v56  ;;  %v3092_v54 = vld [vmem:[#allocation2 + $0x360] ss:$16 sps:$4 sm:$0xff]   ;;  %v3100_v56 = vld [vmem:[#allocation2 + $0x384] ss:$16 sps:$4 sm:$0xff]  }
  0x5b   :  { %1486 = vmatprep.subr.bf16.mxu1 %v3010_v57  ;;  %v3103_v57 = vld [vmem:[#allocation2 + $0x36c] ss:$16 sps:$4 sm:$0xff]  }
  0x5d   :  { %1325 = vmatpush1.bf16.msra.mxu0 %v3011_v59  ;;  %v3101_v59 = vld [vmem:[#allocation2 + $0x368] ss:$16 sps:$4 sm:$0xff]  }
  0x5e   :  { %1487 = vmatpush1.bf16.msra.mxu1 %v3008_v58  ;;  %1326 = vmatprep.subr.bf16.mxu0 %v3012_v60  ;;  %v3098_v58 = vld [vmem:[#allocation2 + $0x380] ss:$16 sps:$4 sm:$0xff]   ;;  %v3106_v60 = vld [vmem:[#allocation2 + $0x3a4] ss:$16 sps:$4 sm:$0xff]  }
  0x5f   :  { %1488 = vmatprep.subr.bf16.mxu1 %v3016_v61  ;;  %v3109_v61 = vld [vmem:[#allocation2 + $0x38c] ss:$16 sps:$4 sm:$0xff]  }
  0x61   :  { %1327 = vmatpush1.bf16.msra.mxu0 %v3017_v63  ;;  %v3107_v63 = vld [vmem:[#allocation2 + $0x388] ss:$16 sps:$4 sm:$0xff]  }
  0x62   :  { %1489 = vmatpush1.bf16.msra.mxu1 %v3014_v62  ;;  %1328 = vmatprep.subr.bf16.mxu0 %v3018_v1  ;;  %v3104_v62 = vld [vmem:[#allocation2 + $0x3a0] ss:$16 sps:$4 sm:$0xff]   ;;  %v3112_v1 = vld [vmem:[#allocation2 + $0x3c4] ss:$16 sps:$4 sm:$0xff]  }
  0x63   :  { %1490 = vmatprep.subr.bf16.mxu1 %v3022_v2  ;;  %v3115_v2 = vld [vmem:[#allocation2 + $0x3ac] ss:$16 sps:$4 sm:$0xff]  }
  0x65   :  { %1329 = vmatpush1.bf16.msra.mxu0 %v3023_v4  ;;  %v3113_v4 = vld [vmem:[#allocation2 + $0x3a8] ss:$16 sps:$4 sm:$0xff]  }
  0x66   :  { %1491 = vmatpush1.bf16.msra.mxu1 %v3020_v3  ;;  %1339 = vmatprep.subr.bf16.mxu0 %v3028_v5  ;;  %v3110_v3 = vld [vmem:[#allocation2 + $0x3c0] ss:$16 sps:$4 sm:$0xff]   ;;  %v3118_v5 = vld [vmem:[#allocation2 + $0x3e4] ss:$16 sps:$4 sm:$0xff]  }
  0x67   :  { %1492 = vmatprep.subr.bf16.mxu1 %v3031_v6  ;;  %v3121_v6 = vld [vmem:[#allocation2 + $0x3cc] ss:$16 sps:$4 sm:$0xff]  }
  0x68   :  { %1331 = vmatmul.mubr.bf16.vlgmr.msra.gmra.mrb[0].mxu0 %v2516_v7 }
  0x69   :  { %1340 = vmatpush1.bf16.msra.mxu0 %v3026_v8  ;;  %1371 = vmatprep.mubr.bf16.mxu0 %v2519_v35  ;;  %v3119_v8 = vld [vmem:[#allocation2 + $0x3c8] ss:$16 sps:$4 sm:$0xff]  }
  0x6a   :  { %1493 = vmatpush1.bf16.msra.mxu1 %v3029_v9  ;;  %1341 = vmatprep.subr.bf16.mxu0 %v3034_v10  ;;  %v3126_v9 = vld [vmem:[#allocation2 + $0x404] ss:$16 sps:$4 sm:$0xff]   ;;  %v3129_v10 = vld [vmem:[#allocation2 + $0x3ec] ss:$16 sps:$4 sm:$0xff]  }
  0x6b   :  { %1503 = vmatprep.subr.bf16.mxu1 %v3037_v11  ;;  %v2518_v11 = vcombine.low %v3534_v32, %v3534_v32  ;;  %v3156_v32 = vld [vmem:[#allocation2 + $0x4a4] ss:$16 sps:$4 sm:$0xff]  }
  0x6d   :  { %1495 = vmatmul.mubr.bf16.vlgmr.msra.gmra.mrb[4].mxu1 %v2516_v7  ;;  %1342 = vmatpush1.bf16.msra.mxu0 %v3032_v12  ;;  %v3116_v7 = vld [vmem:[#allocation2 + $0x3e0] ss:$16 sps:$4 sm:$0xff]  }
  0x6e   :  { %1504 = vmatpush1.bf16.msra.mxu1 %v3035_v13  ;;  %1343 = vmatprep.subr.bf16.mxu0 %v3040_v14  ;;  %v3124_v12 = vld [vmem:[#allocation2 + $0x400] ss:$16 sps:$4 sm:$0xff]   ;;  %v3127_v13 = vld [vmem:[#allocation2 + $0x3e8] ss:$16 sps:$4 sm:$0xff]   ;;  %v3132_v14 = vld [vmem:[#allocation2 + $0x424] ss:$16 sps:$4 sm:$0xff]  }
  0x6f   :  { %1505 = vmatprep.subr.bf16.mxu1 %v3043_v15  ;;  %1535 = vmatprep.mubr.bf16.mxu1 %v2519_v35  ;;  %v3135_v15 = vld [vmem:[#allocation2 + $0x40c] ss:$16 sps:$4 sm:$0xff]   ;;  %v3157_v35 = vld [vmem:[#allocation2 + $0x488] ss:$16 sps:$4 sm:$0xff]  }
  0x71   :  { %1344 = vmatpush1.bf16.msra.mxu0 %v3038_v16  ;;  %v3543_v16 = vld [vmem:[%s3835_s0 + $0x10] sm:$0xff] }
  0x72   :  { %1506 = vmatpush1.bf16.msra.mxu1 %v3041_v17  ;;  %1345 = vmatprep.subr.bf16.mxu0 %v3046_v18  ;;  %v2521_v17 = vcombine.high %v3543_v16, %v3543_v16  ;;  %v3130_v18 = vld [vmem:[#allocation2 + $0x420] ss:$16 sps:$4 sm:$0xff]  }
  0x73   :  { %1507 = vmatprep.subr.bf16.mxu1 %v3049_v19  ;;  %v3133_v19 = vld [vmem:[#allocation2 + $0x408] ss:$16 sps:$4 sm:$0xff]  }
  0x75   :  { %1346 = vmatpush1.bf16.msra.mxu0 %v3044_v20  ;;  %v3138_v20 = vld [vmem:[#allocation2 + $0x444] ss:$16 sps:$4 sm:$0xff]  }
  0x76   :  { %1508 = vmatpush1.bf16.msra.mxu1 %v3047_v21  ;;  %1347 = vmatprep.subr.bf16.mxu0 %v3052_v22  ;;  %v3141_v21 = vld [vmem:[#allocation2 + $0x42c] ss:$16 sps:$4 sm:$0xff]   ;;  %v3136_v22 = vld [vmem:[#allocation2 + $0x440] ss:$16 sps:$4 sm:$0xff]  }
  0x77   :  { %1509 = vmatprep.subr.bf16.mxu1 %v3055_v23  ;;  %v3139_v23 = vld [vmem:[#allocation2 + $0x428] ss:$16 sps:$4 sm:$0xff]  }
  0x79   :  { %1348 = vmatpush1.bf16.msra.mxu0 %v3050_v24  ;;  %v3144_v24 = vld [vmem:[#allocation2 + $0x464] ss:$16 sps:$4 sm:$0xff]  }
  0x7a   :  { %1510 = vmatpush1.bf16.msra.mxu1 %v3053_v25  ;;  %1349 = vmatprep.subr.bf16.mxu0 %v3058_v26  ;;  %v3147_v25 = vld [vmem:[#allocation2 + $0x44c] ss:$16 sps:$4 sm:$0xff]   ;;  %v3142_v26 = vld [vmem:[#allocation2 + $0x460] ss:$16 sps:$4 sm:$0xff]  }
  0x7b   :  { %1511 = vmatprep.subr.bf16.mxu1 %v3061_v27  ;;  %v3145_v27 = vld [vmem:[#allocation2 + $0x448] ss:$16 sps:$4 sm:$0xff]  }
  0x7d   :  { %1350 = vmatpush1.bf16.msra.mxu0 %v3056_v28  ;;  %v3150_v28 = vld [vmem:[#allocation2 + $0x484] ss:$16 sps:$4 sm:$0xff]  }
  0x7e   :  { %1512 = vmatpush1.bf16.msra.mxu1 %v3059_v29  ;;  %1351 = vmatprep.subr.bf16.mxu0 %v3064_v30  ;;  %v3153_v29 = vld [vmem:[#allocation2 + $0x46c] ss:$16 sps:$4 sm:$0xff]   ;;  %v3148_v30 = vld [vmem:[#allocation2 + $0x480] ss:$16 sps:$4 sm:$0xff]  }
  0x7f   :  { %1513 = vmatprep.subr.bf16.mxu1 %v3067_v31  ;;  %v3151_v31 = vld [vmem:[#allocation2 + $0x468] ss:$16 sps:$4 sm:$0xff]  }
  0x81   :  { %1352 = vmatpush1.bf16.msra.mxu0 %v3062_v33  ;;  %v3159_v33 = vld [vmem:[#allocation2 + $0x48c] ss:$16 sps:$4 sm:$0xff]  }
  0x82   :  { %1514 = vmatpush1.bf16.msra.mxu1 %v3065_v34  ;;  %1353 = vmatprep.subr.bf16.mxu0 %v3070_v36  ;;  %v3154_v34 = vld [vmem:[#allocation2 + $0x4a0] ss:$16 sps:$4 sm:$0xff]   ;;  %v3162_v36 = vld [vmem:[#allocation2 + $0x4c4] ss:$16 sps:$4 sm:$0xff]  }
  0x83   :  { %1515 = vmatprep.subr.bf16.mxu1 %v3073_v37  ;;  %v3165_v37 = vld [vmem:[#allocation2 + $0x4ac] ss:$16 sps:$4 sm:$0xff]  }
  0x85   :  { %1354 = vmatpush1.bf16.msra.mxu0 %v3068_v38  ;;  %v3160_v38 = vld [vmem:[#allocation2 + $0x4c0] ss:$16 sps:$4 sm:$0xff]  }
  0x86   :  { %1516 = vmatpush1.bf16.msra.mxu1 %v3071_v39  ;;  %1355 = vmatprep.subr.bf16.mxu0 %v3076_v40  ;;  %v3163_v39 = vld [vmem:[#allocation2 + $0x4a8] ss:$16 sps:$4 sm:$0xff]   ;;  %v3168_v40 = vld [vmem:[#allocation2 + $0x4e4] ss:$16 sps:$4 sm:$0xff]  }
  0x87   :  { %1517 = vmatprep.subr.bf16.mxu1 %v3079_v41  ;;  %v3171_v41 = vld [vmem:[#allocation2 + $0x4cc] ss:$16 sps:$4 sm:$0xff]  }
  0x89   :  { %1356 = vmatpush1.bf16.msra.mxu0 %v3074_v42  ;;  %v3166_v42 = vld [vmem:[#allocation2 + $0x4e0] ss:$16 sps:$4 sm:$0xff]  }
  0x8a   :  { %1518 = vmatpush1.bf16.msra.mxu1 %v3077_v43  ;;  %1357 = vmatprep.subr.bf16.mxu0 %v3082_v44  ;;  %v3169_v43 = vld [vmem:[#allocation2 + $0x4c8] ss:$16 sps:$4 sm:$0xff]   ;;  %v3174_v44 = vld [vmem:[#allocation2 + $0x504] ss:$16 sps:$4 sm:$0xff]  }
  0x8b   :  { %1519 = vmatprep.subr.bf16.mxu1 %v3085_v45  ;;  %v3177_v45 = vld [vmem:[#allocation2 + $0x4ec] ss:$16 sps:$4 sm:$0xff]  }
  0x8d   :  { %1358 = vmatpush1.bf16.msra.mxu0 %v3080_v46  ;;  %v3172_v46 = vld [vmem:[#allocation2 + $0x500] ss:$16 sps:$4 sm:$0xff]  }
  0x8e   :  { %1520 = vmatpush1.bf16.msra.mxu1 %v3083_v47  ;;  %1359 = vmatprep.subr.bf16.mxu0 %v3088_v48  ;;  %v3175_v47 = vld [vmem:[#allocation2 + $0x4e8] ss:$16 sps:$4 sm:$0xff]   ;;  %v3180_v48 = vld [vmem:[#allocation2 + $0x524] ss:$16 sps:$4 sm:$0xff]  }
  0x8f   :  { %1521 = vmatprep.subr.bf16.mxu1 %v3091_v49  ;;  %v3183_v49 = vld [vmem:[#allocation2 + $0x50c] ss:$16 sps:$4 sm:$0xff]  }
  0x91   :  { %1360 = vmatpush1.bf16.msra.mxu0 %v3086_v50  ;;  %v3178_v50 = vld [vmem:[#allocation2 + $0x520] ss:$16 sps:$4 sm:$0xff]  }
  0x92   :  { %1522 = vmatpush1.bf16.msra.mxu1 %v3089_v51  ;;  %1361 = vmatprep.subr.bf16.mxu0 %v3094_v52  ;;  %v3181_v51 = vld [vmem:[#allocation2 + $0x508] ss:$16 sps:$4 sm:$0xff]   ;;  %v3186_v52 = vld [vmem:[#allocation2 + $0x544] ss:$16 sps:$4 sm:$0xff]  }
  0x93   :  { %1523 = vmatprep.subr.bf16.mxu1 %v3097_v53  ;;  %v3189_v53 = vld [vmem:[#allocation2 + $0x52c] ss:$16 sps:$4 sm:$0xff]  }
  0x95   :  { %1362 = vmatpush1.bf16.msra.mxu0 %v3092_v54  ;;  %v3184_v54 = vld [vmem:[#allocation2 + $0x540] ss:$16 sps:$4 sm:$0xff]  }
  0x96   :  { %1524 = vmatpush1.bf16.msra.mxu1 %v3095_v55  ;;  %1363 = vmatprep.subr.bf16.mxu0 %v3100_v56  ;;  %v3187_v55 = vld [vmem:[#allocation2 + $0x528] ss:$16 sps:$4 sm:$0xff]   ;;  %v3192_v56 = vld [vmem:[#allocation2 + $0x564] ss:$16 sps:$4 sm:$0xff]  }
  0x97   :  { %1525 = vmatprep.subr.bf16.mxu1 %v3103_v57  ;;  %v3195_v57 = vld [vmem:[#allocation2 + $0x54c] ss:$16 sps:$4 sm:$0xff]  }
  0x99   :  { %1364 = vmatpush1.bf16.msra.mxu0 %v3098_v58  ;;  %v3190_v58 = vld [vmem:[#allocation2 + $0x560] ss:$16 sps:$4 sm:$0xff]  }
  0x9a   :  { %1526 = vmatpush1.bf16.msra.mxu1 %v3101_v59  ;;  %1365 = vmatprep.subr.bf16.mxu0 %v3106_v60  ;;  %v3193_v59 = vld [vmem:[#allocation2 + $0x548] ss:$16 sps:$4 sm:$0xff]   ;;  %v3198_v60 = vld [vmem:[#allocation2 + $0x584] ss:$16 sps:$4 sm:$0xff]  }
  0x9b   :  { %1527 = vmatprep.subr.bf16.mxu1 %v3109_v61  ;;  %v3201_v61 = vld [vmem:[#allocation2 + $0x56c] ss:$16 sps:$4 sm:$0xff]  }
  0x9d   :  { %1366 = vmatpush1.bf16.msra.mxu0 %v3104_v62  ;;  %v3196_v62 = vld [vmem:[#allocation2 + $0x580] ss:$16 sps:$4 sm:$0xff]  }
  0x9e   :  { %1528 = vmatpush1.bf16.msra.mxu1 %v3107_v63  ;;  %1367 = vmatprep.subr.bf16.mxu0 %v3112_v1  ;;  %v3199_v63 = vld [vmem:[#allocation2 + $0x568] ss:$16 sps:$4 sm:$0xff]   ;;  %v3204_v1 = vld [vmem:[#allocation2 + $0x5a4] ss:$16 sps:$4 sm:$0xff]  }
  0x9f   :  { %1529 = vmatprep.subr.bf16.mxu1 %v3115_v2  ;;  %v3207_v2 = vld [vmem:[#allocation2 + $0x58c] ss:$16 sps:$4 sm:$0xff]  }
  0xa1   :  { %1368 = vmatpush1.bf16.msra.mxu0 %v3110_v3  ;;  %v3202_v3 = vld [vmem:[#allocation2 + $0x5a0] ss:$16 sps:$4 sm:$0xff]  }
  0xa2   :  { %1530 = vmatpush1.bf16.msra.mxu1 %v3113_v4  ;;  %1369 = vmatprep.subr.bf16.mxu0 %v3118_v5  ;;  %v3205_v4 = vld [vmem:[#allocation2 + $0x588] ss:$16 sps:$4 sm:$0xff]   ;;  %v3210_v5 = vld [vmem:[#allocation2 + $0x5c4] ss:$16 sps:$4 sm:$0xff]  }
  0xa3   :  { %1531 = vmatprep.subr.bf16.mxu1 %v3121_v6  ;;  %v3213_v6 = vld [vmem:[#allocation2 + $0x5ac] ss:$16 sps:$4 sm:$0xff]  }
  0xa5   :  { %1370 = vmatpush1.bf16.msra.mxu0 %v3116_v7  ;;  %v3208_v7 = vld [vmem:[#allocation2 + $0x5c0] ss:$16 sps:$4 sm:$0xff]  }
  0xa6   :  { %1532 = vmatpush1.bf16.msra.mxu1 %v3119_v8  ;;  %1380 = vmatprep.subr.bf16.mxu0 %v3126_v9  ;;  %v3211_v8 = vld [vmem:[#allocation2 + $0x5a8] ss:$16 sps:$4 sm:$0xff]   ;;  %v3216_v9 = vld [vmem:[#allocation2 + $0x5e4] ss:$16 sps:$4 sm:$0xff]  }
  0xa7   :  { %1533 = vmatprep.subr.bf16.mxu1 %v3129_v10  ;;  %v3219_v10 = vld [vmem:[#allocation2 + $0x5cc] ss:$16 sps:$4 sm:$0xff]  }
  0xa8   :  { %1372 = vmatmul.mubr.bf16.vlgmr.msra.gmra.mrb[0].mxu0 %v2518_v11 }
  0xa9   :  { %1381 = vmatpush1.bf16.msra.mxu0 %v3124_v12  ;;  %1412 = vmatprep.mubr.bf16.mxu0 %v2521_v17  ;;  %v3217_v12 = vld [vmem:[#allocation2 + $0x5c8] ss:$16 sps:$4 sm:$0xff]  }
  0xaa   :  { %1534 = vmatpush1.bf16.msra.mxu1 %v3127_v13  ;;  %1382 = vmatprep.subr.bf16.mxu0 %v3132_v14  ;;  %v3224_v13 = vld [vmem:[#allocation2 + $0x5ec] ss:$16 sps:$4 sm:$0xff]  }
  0xab   :  { %1544 = vmatprep.subr.bf16.mxu1 %v3135_v15  ;;  %v3230_v14 = vld [vmem:[%s3838_s3 + $0x4] ss:$8 sps:$4 sm:$0xff]   ;;  %v2520_v15 = vcombine.low %v3543_v16, %v3543_v16  ;;  %v3231_v16 = vld [vmem:[%s3838_s3 + $0x10] ss:$8 sps:$4 sm:$0xff]  }
  0xad   :  { %1536 = vmatmul.mubr.bf16.vlgmr.msra.gmra.mrb[4].mxu1 %v2518_v11  ;;  %1383 = vmatpush1.bf16.msra.mxu0 %v3130_v18  ;;  %v3214_v11 = vld [vmem:[#allocation2 + $0x5e0] ss:$16 sps:$4 sm:$0xff]  }
  0xae   :  { %1545 = vmatpush1.bf16.msra.mxu1 %v3133_v19  ;;  %1384 = vmatprep.subr.bf16.mxu0 %v3138_v20  ;;  %v3228_v18 = vld [vmem:[%s3838_s3] ss:$8 sps:$4 sm:$0xff]   ;;  %v3227_v19 = vld [vmem:[#allocation2 + $0x60c] ss:$16 sps:$4 sm:$0xff]  }
  0xaf   :  { %1546 = vmatprep.subr.bf16.mxu1 %v3141_v21  ;;  %1576 = vmatprep.mubr.bf16.mxu1 %v2521_v17  ;;  %v3222_v17 = vld [vmem:[#allocation2 + $0x5e8] ss:$16 sps:$4 sm:$0xff]   ;;  %v3233_v20 = vld [vmem:[%s3838_s3 + $0x14] ss:$8 sps:$4 sm:$0xff]  }
  0xb0   :  { %v3225_v21 = vld [vmem:[#allocation2 + $0x608] ss:$16 sps:$4 sm:$0xff]  }
  0xb1   :  { %1385 = vmatpush1.bf16.msra.mxu0 %v3136_v22  ;;  %v3236_v22 = vld [vmem:[%s3838_s3 + $0x24] ss:$8 sps:$4 sm:$0xff]  }
  0xb2   :  { %1547 = vmatpush1.bf16.msra.mxu1 %v3139_v23  ;;  %1386 = vmatprep.subr.bf16.mxu0 %v3144_v24  ;;  %v3234_v23 = vld [vmem:[%s3838_s3 + $0x20] ss:$8 sps:$4 sm:$0xff]   ;;  %v3239_v24 = vld [vmem:[%s3838_s3 + $0x34] ss:$8 sps:$4 sm:$0xff]  }
  0xb3   :  { %1548 = vmatprep.subr.bf16.mxu1 %v3147_v25  ;;  %v3237_v25 = vld [vmem:[%s3838_s3 + $0x30] ss:$8 sps:$4 sm:$0xff]  }
  0xb5   :  { %1387 = vmatpush1.bf16.msra.mxu0 %v3142_v26  ;;  %v3240_v26 = vld [vmem:[%s3838_s3 + $0x40] ss:$8 sps:$4 sm:$0xff]  }
  0xb6   :  { %1549 = vmatpush1.bf16.msra.mxu1 %v3145_v27  ;;  %1388 = vmatprep.subr.bf16.mxu0 %v3150_v28  ;;  %v3245_v27 = vld [vmem:[%s3838_s3 + $0x54] ss:$8 sps:$4 sm:$0xff]   ;;  %v3356_v28 = vld [vmem:[%s3835_s0 + $0x18] ss:$0 sps:$4 sm:$0xff]  }
  0xb7   :  { %1550 = vmatprep.subr.bf16.mxu1 %v3153_v29  ;;  %v3243_v29 = vld [vmem:[%s3838_s3 + $0x50] ss:$8 sps:$4 sm:$0xff]  }
  0xb9   :  { %1389 = vmatpush1.bf16.msra.mxu0 %v3148_v30  ;;  %v3248_v30 = vld [vmem:[%s3838_s3 + $0x64] ss:$8 sps:$4 sm:$0xff]  }
  0xba   :  { %1551 = vmatpush1.bf16.msra.mxu1 %v3151_v31  ;;  %1390 = vmatprep.subr.bf16.mxu0 %v3156_v32  ;;  %v3246_v31 = vld [vmem:[%s3838_s3 + $0x60] ss:$8 sps:$4 sm:$0xff]  }
  0xbb   :  { %1552 = vmatprep.subr.bf16.mxu1 %v3159_v33  ;;  %v3251_v33 = vld [vmem:[%s3838_s3 + $0x74] ss:$8 sps:$4 sm:$0xff]  }
  0xbd   :  { %1391 = vmatpush1.bf16.msra.mxu0 %v3154_v34 }
  0xbe   :  { %1553 = vmatpush1.bf16.msra.mxu1 %v3157_v35  ;;  %1392 = vmatprep.subr.bf16.mxu0 %v3162_v36 }
  0xbf   :  { %1554 = vmatprep.subr.bf16.mxu1 %v3165_v37  ;;  %v3249_v37 = vld [vmem:[%s3838_s3 + $0x70] ss:$8 sps:$4 sm:$0xff]  }
  0xc1   :  { %1393 = vmatpush1.bf16.msra.mxu0 %v3160_v38  ;;  %v3254_v38 = vld [vmem:[%s3838_s3 + $0x84] ss:$8 sps:$4 sm:$0xff]  }
  0xc2   :  { %1555 = vmatpush1.bf16.msra.mxu1 %v3163_v39  ;;  %1394 = vmatprep.subr.bf16.mxu0 %v3168_v40  ;;  %v3252_v39 = vld [vmem:[%s3838_s3 + $0x80] ss:$8 sps:$4 sm:$0xff]   ;;  %v3257_v40 = vld [vmem:[%s3838_s3 + $0x94] ss:$8 sps:$4 sm:$0xff]  }
  0xc3   :  { %1556 = vmatprep.subr.bf16.mxu1 %v3171_v41  ;;  %v3255_v41 = vld [vmem:[%s3838_s3 + $0x90] ss:$8 sps:$4 sm:$0xff]  }
  0xc5   :  { %1395 = vmatpush1.bf16.msra.mxu0 %v3166_v42  ;;  %v3260_v42 = vld [vmem:[%s3838_s3 + $0xa4] ss:$8 sps:$4 sm:$0xff]  }
  0xc6   :  { %1557 = vmatpush1.bf16.msra.mxu1 %v3169_v43  ;;  %1396 = vmatprep.subr.bf16.mxu0 %v3174_v44  ;;  %v3258_v43 = vld [vmem:[%s3838_s3 + $0xa0] ss:$8 sps:$4 sm:$0xff]   ;;  %v3263_v44 = vld [vmem:[%s3838_s3 + $0xb4] ss:$8 sps:$4 sm:$0xff]  }
  0xc7   :  { %1558 = vmatprep.subr.bf16.mxu1 %v3177_v45  ;;  %v3261_v45 = vld [vmem:[%s3838_s3 + $0xb0] ss:$8 sps:$4 sm:$0xff]  }
  0xc9   :  { %1397 = vmatpush1.bf16.msra.mxu0 %v3172_v46  ;;  %v3266_v46 = vld [vmem:[%s3838_s3 + $0xc4] ss:$8 sps:$4 sm:$0xff]  }
  0xca   :  { %1559 = vmatpush1.bf16.msra.mxu1 %v3175_v47  ;;  %1398 = vmatprep.subr.bf16.mxu0 %v3180_v48  ;;  %v3264_v47 = vld [vmem:[%s3838_s3 + $0xc0] ss:$8 sps:$4 sm:$0xff]   ;;  %v3269_v48 = vld [vmem:[%s3838_s3 + $0xd4] ss:$8 sps:$4 sm:$0xff]  }
  0xcb   :  { %1560 = vmatprep.subr.bf16.mxu1 %v3183_v49  ;;  %v3267_v49 = vld [vmem:[%s3838_s3 + $0xd0] ss:$8 sps:$4 sm:$0xff]  }
  0xcd   :  { %1399 = vmatpush1.bf16.msra.mxu0 %v3178_v50  ;;  %v3272_v50 = vld [vmem:[%s3838_s3 + $0xe4] ss:$8 sps:$4 sm:$0xff]  }
  0xce   :  { %1561 = vmatpush1.bf16.msra.mxu1 %v3181_v51  ;;  %1400 = vmatprep.subr.bf16.mxu0 %v3186_v52  ;;  %v3270_v51 = vld [vmem:[%s3838_s3 + $0xe0] ss:$8 sps:$4 sm:$0xff]   ;;  %v3275_v52 = vld [vmem:[%s3838_s3 + $0xf4] ss:$8 sps:$4 sm:$0xff]  }
  0xcf   :  { %1562 = vmatprep.subr.bf16.mxu1 %v3189_v53  ;;  %v3273_v53 = vld [vmem:[%s3838_s3 + $0xf0] ss:$8 sps:$4 sm:$0xff]  }
  0xd1   :  { %1401 = vmatpush1.bf16.msra.mxu0 %v3184_v54  ;;  %v3278_v54 = vld [vmem:[%s3838_s3 + $0x104] ss:$8 sps:$4 sm:$0xff]  }
  0xd2   :  { %1563 = vmatpush1.bf16.msra.mxu1 %v3187_v55  ;;  %1402 = vmatprep.subr.bf16.mxu0 %v3192_v56  ;;  %v3324_v55 = vld [vmem:[#allocation5 + $0x40] sm:$0xff]  }
  0xd3   :  { %1564 = vmatprep.subr.bf16.mxu1 %v3195_v57  ;;  %v3325_v56 = vld [vmem:[#allocation5] sm:$0xff]   ;;  %v3326_v57 = vld [vmem:[#allocation5 + $0x48] sm:$0xff]  }
  0xd5   :  { %1403 = vmatpush1.bf16.msra.mxu0 %v3190_v58  ;;  %v3327_v58 = vld [vmem:[#allocation5 + $0x8] sm:$0xff]  }
  0xd6   :  { %1565 = vmatpush1.bf16.msra.mxu1 %v3193_v59  ;;  %1404 = vmatprep.subr.bf16.mxu0 %v3198_v60  ;;  %v3328_v59 = vld [vmem:[#allocation5 + $0x50] sm:$0xff]  }
  0xd7   :  { %1566 = vmatprep.subr.bf16.mxu1 %v3201_v61  ;;  %v3329_v60 = vld [vmem:[#allocation5 + $0x10] sm:$0xff]   ;;  %v3330_v61 = vld [vmem:[#allocation5 + $0x58] sm:$0xff]  }
  0xd9   :  { %1405 = vmatpush1.bf16.msra.mxu0 %v3196_v62  ;;  %v3331_v62 = vld [vmem:[#allocation5 + $0x18] sm:$0xff]  }
  0xda   :  { %1567 = vmatpush1.bf16.msra.mxu1 %v3199_v63  ;;  %1406 = vmatprep.subr.bf16.mxu0 %v3204_v1  ;;  %v3332_v63 = vld [vmem:[#allocation5 + $0x60] sm:$0xff]  }
  0xdb   :  { %1568 = vmatprep.subr.bf16.mxu1 %v3207_v2  ;;  %v3333_v1 = vld [vmem:[#allocation5 + $0x20] sm:$0xff]   ;;  %v3334_v2 = vld [vmem:[#allocation5 + $0x68] sm:$0xff]  }
  0xdd   :  { %1407 = vmatpush1.bf16.msra.mxu0 %v3202_v3  ;;  %v3335_v3 = vld [vmem:[#allocation5 + $0x28] sm:$0xff]  }
  0xde   :  { %1569 = vmatpush1.bf16.msra.mxu1 %v3205_v4  ;;  %1408 = vmatprep.subr.bf16.mxu0 %v3210_v5  ;;  %v270_v4 = vlaneseq }
  0xdf   :  { %1570 = vmatprep.subr.bf16.mxu1 %v3213_v6 }
  0xe0   :  { %v3657_v5 = vshrl.u32 %v270_v4, 7  ;;  %v3336_v4 = vld [vmem:[#allocation5 + $0x70] sm:$0xff]  }
  0xe1   :  { %1409 = vmatpush1.bf16.msra.mxu0 %v3208_v7  ;;  %v3663_v7 = vld [vmem:[%s3837_s2] sm:$0xf] }
  0xe2   :  { %1571 = vmatpush1.bf16.msra.mxu1 %v3211_v8  ;;  %1410 = vmatprep.subr.bf16.mxu0 %v3216_v9  ;;  %v272_v6 = vsub.s32 0, %v3657_v5  ;;  %v276_v8 = vsub.s32 1, %v3657_v5 }
  0xe3   :  { %1572 = vmatprep.subr.bf16.mxu1 %v3219_v10 }
  0xe4   :  { %v273_v9 = vrot.slane %v3663_v7, %v272_v6  ;;  %v277_v10 = vrot.slane %v3663_v7, %v276_v8 }
  0xe5   :  { %1411 = vmatpush1.bf16.msra.mxu0 %v3214_v11 }
  0xe6   :  { %1573 = vmatpush1.bf16.msra.mxu1 %v3217_v12  ;;  %2030 = vmatprep.subr.bf16.mxu0 %v3230_v14 }
  0xe7   :  { %1574 = vmatprep.subr.bf16.mxu1 %v3224_v13 }
  0xe8   :  { %1413 = vmatmul.mubr.bf16.vlgmr.msra.gmra.mrb[0].mxu0 %v2520_v15 }
  0xe9   :  { %2031 = vmatpush1.bf16.msra.mxu0 %v3228_v18 }
  0xea   :  { %1575 = vmatpush1.bf16.msra.mxu1 %v3222_v17  ;;  %2032 = vmatprep.subr.bf16.mxu0 %v3233_v20 }
  0xeb   :  { %1585 = vmatprep.subr.bf16.mxu1 %v3227_v19 }
  0xed   :  { %1577 = vmatmul.mubr.bf16.vlgmr.msra.gmra.mrb[4].mxu1 %v2520_v15  ;;  %2033 = vmatpush1.bf16.msra.mxu0 %v3231_v16 }
  0xee   :  { %1586 = vmatpush1.bf16.msra.mxu1 %v3225_v21  ;;  %1617 = vmatprep.mubr.bf16.mxu1 %v3435_v0  ;;  %v3242_v0 = vld [vmem:[%s3838_s3 + $0x44] ss:$8 sps:$4 sm:$0xff]  }
  0xef   :  { %2034 = vmatprep.subr.bf16.mxu0 %v3236_v22  ;;  %2817 = vmatprep.subr.bf16.mxu1 %v3324_v55  ;;  %v3276_v22 = vld [vmem:[%s3838_s3 + $0x100] ss:$8 sps:$4 sm:$0xff]  }
  0xf0   :  { %v3312_v55 = vld [vmem:[%s3838_s3 + $0x1c0] ss:$8 sps:$4 sm:$0xff]  }
  0xf1   :  { %2035 = vmatpush1.bf16.msra.mxu0 %v3234_v23 }
  0xf2   :  { %2036 = vmatprep.subr.bf16.mxu0 %v3239_v24  ;;  %v3281_v24 = vld [vmem:[%s3838_s3 + $0x114] ss:$8 sps:$4 sm:$0xff]  }
  0xf5   :  { %2037 = vmatpush1.bf16.msra.mxu0 %v3237_v25  ;;  %v284_v25 = vsub.s32 3, %v3657_v5 }
  0xf6   :  { %2038 = vmatprep.subr.bf16.mxu0 %v3242_v0  ;;  %v3279_v0 = vld [vmem:[%s3838_s3 + $0x110] ss:$8 sps:$4 sm:$0xff]  }
  0xf9   :  { %2720 = vmatmul.mubr.msk.bf16.vlgmr.msra.gmra.mrb[4].mxu1 %vm1294_vm0, %v3356_v28  ;;  %2039 = vmatpush1.bf16.msra.mxu0 %v3240_v26  ;;  %v3284_v26 = vld [vmem:[%s3838_s3 + $0x124] ss:$8 sps:$4 sm:$0xff]  }
  0xfa   :  { %2040 = vmatprep.subr.bf16.mxu0 %v3245_v27  ;;  %2818 = vmatpush3.bf16.msra.mxu1 %v3325_v56  ;;  %v285_v27 = vrot.slane %v3663_v7, %v284_v25  ;;  %v280_v56 = vsub.s32 2, %v3657_v5  ;;  %v3341_v5 = vld [vmem:[%s3842_s7 + $0x8] sm:$0xff]  }
  0xfb   :  { %2819 = vmatprep.subr.bf16.mxu1 %v3326_v57  ;;  %v3317_v57 = vld [vmem:[%s3838_s3 + $0x1d4] ss:$8 sps:$4 sm:$0xff]  }
  0xfd   :  { %2041 = vmatpush1.bf16.msra.mxu0 %v3243_v29  ;;  %v3282_v29 = vld [vmem:[%s3838_s3 + $0x120] ss:$8 sps:$4 sm:$0xff]  }
  0xfe   :  { %2042 = vmatprep.subr.bf16.mxu0 %v3248_v30  ;;  %2820 = vmatpush3.bf16.msra.mxu1 %v3327_v58  ;;  %v3315_v58 = vld [vmem:[%s3838_s3 + $0x1d0] ss:$8 sps:$4 sm:$0xff]  }
  0xff   :  { %2821 = vmatprep.subr.bf16.mxu1 %v3328_v59  ;;  %v281_v59 = vrot.slane %v3663_v7, %v280_v56  ;;  %v3337_v7 = vld [vmem:[#allocation5 + $0x30] sm:$0xff]  }
 0x100   :  { %v3596_v32 = vpop.f32.mrb[0].mxu1 }
 0x101   :  { %v3601_v34 = vpop.f32.mrb[1].mxu1  ;;  %2043 = vmatpush1.bf16.msra.mxu0 %v3246_v31  ;;  %v3287_v31 = vld [vmem:[%s3838_s3 + $0x134] ss:$8 sps:$4 sm:$0xff]  }
 0x102   :  { %v1459_v35 = vpop.f32.mrb[2].mxu1  ;;  %2044 = vmatprep.subr.bf16.mxu0 %v3251_v33  ;;  %2822 = vmatpush3.bf16.msra.mxu1 %v3329_v60  ;;  %v3320_v60 = vld [vmem:[%s3838_s3 + $0x1e4] ss:$8 sps:$4 sm:$0xff]  }
 0x103   :  { %v1460_v36 = vpop.f32.mrb[3].mxu1  ;;  %2823 = vmatprep.subr.bf16.mxu1 %v3330_v61  ;;  %v3318_v61 = vld [vmem:[%s3838_s3 + $0x1e0] ss:$8 sps:$4 sm:$0xff]  }
 0x104   :  { %v3285_v36 = vld [vmem:[%s3838_s3 + $0x130] ss:$8 sps:$4 sm:$0xff]  }
 0x105   :  { %2045 = vmatpush1.bf16.msra.mxu0 %v3249_v37  ;;  %v3290_v37 = vld [vmem:[%s3838_s3 + $0x144] ss:$8 sps:$4 sm:$0xff]  }
 0x106   :  { %2046 = vmatprep.subr.bf16.mxu0 %v3254_v38  ;;  %2824 = vmatpush3.bf16.msra.mxu1 %v3331_v62 }
 0x107   :  { %2825 = vmatprep.subr.bf16.mxu1 %v3332_v63  ;;  %v3323_v63 = vld [vmem:[%s3838_s3 + $0x1f4] ss:$8 sps:$4 sm:$0xff]  }
 0x109   :  { %2047 = vmatpush1.bf16.msra.mxu0 %v3252_v39  ;;  %v3288_v39 = vld [vmem:[%s3838_s3 + $0x140] ss:$8 sps:$4 sm:$0xff]  }
 0x10a   :  { %2048 = vmatprep.subr.bf16.mxu0 %v3257_v40  ;;  %2826 = vmatpush3.bf16.msra.mxu1 %v3333_v1  ;;  %v3293_v40 = vld [vmem:[%s3838_s3 + $0x154] ss:$8 sps:$4 sm:$0xff]   ;;  %v3321_v1 = vld [vmem:[%s3838_s3 + $0x1f0] ss:$8 sps:$4 sm:$0xff]  }
 0x10b   :  { %2827 = vmatprep.subr.bf16.mxu1 %v3334_v2 }
 0x10d   :  { %2049 = vmatpush1.bf16.msra.mxu0 %v3255_v41  ;;  %v3291_v41 = vld [vmem:[%s3838_s3 + $0x150] ss:$8 sps:$4 sm:$0xff]  }
 0x10e   :  { %2050 = vmatprep.subr.bf16.mxu0 %v3260_v42  ;;  %2828 = vmatpush3.bf16.msra.mxu1 %v3335_v3  ;;  %v3296_v42 = vld [vmem:[%s3838_s3 + $0x164] ss:$8 sps:$4 sm:$0xff]  }
 0x10f   :  { %2829 = vmatprep.subr.bf16.mxu1 %v3336_v4 }
 0x111   :  { %2051 = vmatpush1.bf16.msra.mxu0 %v3258_v43  ;;  %v3294_v43 = vld [vmem:[%s3838_s3 + $0x160] ss:$8 sps:$4 sm:$0xff]  }
 0x112   :  { %2052 = vmatprep.subr.bf16.mxu0 %v3263_v44  ;;  %v3299_v44 = vld [vmem:[%s3838_s3 + $0x174] ss:$8 sps:$4 sm:$0xff]   ;;  %2830 = vmatpush3.bf16.msra.mxu1 %v3337_v7 }
 0x115   :  { %2053 = vmatpush1.bf16.msra.mxu0 %v3261_v45  ;;  %v3297_v45 = vld [vmem:[%s3838_s3 + $0x170] ss:$8 sps:$4 sm:$0xff]  }
 0x116   :  { %2054 = vmatprep.subr.bf16.mxu0 %v3266_v46  ;;  %v3302_v46 = vld [vmem:[%s3838_s3 + $0x184] ss:$8 sps:$4 sm:$0xff]  }
 0x119   :  { %2055 = vmatpush1.bf16.msra.mxu0 %v3264_v47  ;;  %v3300_v47 = vld [vmem:[%s3838_s3 + $0x180] ss:$8 sps:$4 sm:$0xff]  }
 0x11a   :  { %2056 = vmatprep.subr.bf16.mxu0 %v3269_v48  ;;  %v3305_v48 = vld [vmem:[%s3838_s3 + $0x194] ss:$8 sps:$4 sm:$0xff]  }
 0x11d   :  { %2057 = vmatpush1.bf16.msra.mxu0 %v3267_v49  ;;  %v3303_v49 = vld [vmem:[%s3838_s3 + $0x190] ss:$8 sps:$4 sm:$0xff]  }
 0x11e   :  { %2058 = vmatprep.subr.bf16.mxu0 %v3272_v50  ;;  %v3308_v50 = vld [vmem:[%s3838_s3 + $0x1a4] ss:$8 sps:$4 sm:$0xff]  }
 0x121   :  { %2059 = vmatpush1.bf16.msra.mxu0 %v3270_v51  ;;  %v3306_v51 = vld [vmem:[%s3838_s3 + $0x1a0] ss:$8 sps:$4 sm:$0xff]  }
 0x122   :  { %2060 = vmatprep.subr.bf16.mxu0 %v3275_v52  ;;  %v3311_v52 = vld [vmem:[%s3838_s3 + $0x1b4] ss:$8 sps:$4 sm:$0xff]  }
 0x125   :  { %2061 = vmatpush1.bf16.msra.mxu0 %v3273_v53  ;;  %v3309_v53 = vld [vmem:[%s3838_s3 + $0x1b0] ss:$8 sps:$4 sm:$0xff]  }
 0x126   :  { %2071 = vmatprep.subr.bf16.mxu0 %v3278_v54  ;;  %v3314_v54 = vld [vmem:[%s3838_s3 + $0x1c4] ss:$8 sps:$4 sm:$0xff]  }
 0x1bb   :  { %v1414_v11 = vpop.f32.mrb[0].mxu0 }
 0x1bc   :  { %v2885_v12 = vadd.f32 %v1414_v11, %v273_v9  ;;  %v1416_v13 = vpop.f32.mrb[1].mxu0  ;;  %v3338_v9 = vld [vmem:[#allocation5 + $0x78] sm:$0xff]   ;;  %v3436_v11 = vmov 0.0  }
 0x1bd   :  { %v2887_v14 = vadd.f32 %v1416_v13, %v277_v10  ;;  %v1418_v15 = vpop.f32.mrb[2].mxu0  ;;  %v3339_v10 = vld [vmem:[#allocation5 + $0x38] sm:$0xff]   ;;  %2831 = vmatprep.subr.bf16.mxu1 %v3338_v9 }
 0x1be   :  { %v2886_v17 = vadd.f32 %v2885_v12, %v3596_v32  ;;  %v1419_v18 = vpop.f32.mrb[3].mxu0  ;;  %2832 = vmatpush3.bf16.msra.mxu1 %v3339_v10  ;;  %v1698_v12 = vld [vmem:[%s3839_s4] sm:$0x3] }
 0x1bf   :  { %v2888_v19 = vadd.f32 %v2887_v14, %v3601_v34  ;;  %2853 = vmatprep.subr.bf16.mxu1 %v3436_v11  ;;  %v1703_v13 = vrot.slane %v1698_v12, %v272_v6  ;;  %v1707_v14 = vrot.slane %v1698_v12, %v276_v8  ;;  %v3342_v6 = vld [vmem:[%s3842_s7 + $0x10] sm:$0xff]   ;;  %v3343_v8 = vld [vmem:[%s3842_s7 + $0x18] sm:$0xff]  }
 0x1c0   :  { %v1626_v20 = vmax.f32 %v2886_v17, 0.0 }
 0x1c1   :  { %v1627_v21 = vmax.f32 %v2888_v19, 0.0 }
 0x1c2   :  { %v1630_v23 = vpack.c.bf16 %v1626_v20, %v1626_v20 }
 0x1c3   :  { %v1631_v16 = vpack.c.bf16 %v1627_v21, %v1627_v21 }
 0x1c5   :  { %2062 = vmatprep.mubr.bf16.mxu0 %v1631_v16 }
 0x1c6   :  { %2063 = vmatmul.mubr.bf16.vlgmr.msra.gmra.mrb[4].mxu0 %v1630_v23 }
 0x1c7   :  { %2072 = vmatpush1.bf16.msra.mxu0 %v3276_v22 }
 0x1c8   :  { %2073 = vmatprep.subr.bf16.mxu0 %v3281_v24  ;;  %v3340_v24 = vld [vmem:[%s3842_s7] sm:$0xff]  }
 0x1cb   :  { %2074 = vmatpush1.bf16.msra.mxu0 %v3279_v0  ;;  %v3344_v0 = vld [vmem:[%s3842_s7 + $0x20] sm:$0xff]  }
 0x1cc   :  { %v1619_v28 = vpop.f32.mrb[4].mxu1  ;;  %2075 = vmatprep.subr.bf16.mxu0 %v3284_v26  ;;  %v3345_v26 = vld [vmem:[%s3842_s7 + $0x28] sm:$0xff]  }
 0x1cd   :  { %v1621_v30 = vpop.f32.mrb[5].mxu1  ;;  %v2889_v62 = vadd.f32 %v1619_v28, %v281_v59  ;;  %v3347_v28 = vld [vmem:[%s3842_s7 + $0x38] sm:$0xff]  }
 0x1ce   :  { %v2890_v32 = vadd.f32 %v1621_v30, %v285_v27  ;;  %v1623_v33 = vpop.f32.mrb[6].mxu1  ;;  %v3346_v27 = vld [vmem:[%s3842_s7 + $0x30] sm:$0xff]   ;;  %v2785_v30 = vld [vmem:[%s3841_s6] ss:$0 sm:$0xff] }
 0x1cf   :  { %v1624_v34 = vpop.f32.mrb[7].mxu1  ;;  %2076 = vmatpush1.bf16.msra.mxu0 %v3282_v29  ;;  %v1628_v2 = vmax.f32 %v2889_v62, 0.0 }
 0x1d0   :  { %v1629_v35 = vmax.f32 %v2890_v32, 0.0  ;;  %2077 = vmatprep.subr.bf16.mxu0 %v3287_v31 }
 0x1d1   :  { %v1632_v3 = vpack.c.bf16 %v1628_v2, %v1628_v2 }
 0x1d2   :  { %v1633_v38 = vpack.c.bf16 %v1629_v35, %v1629_v35 }
 0x1d3   :  { %2078 = vmatpush1.bf16.msra.mxu0 %v3285_v36 }
 0x1d4   :  { %2103 = vmatprep.mubr.bf16.mxu0 %v1633_v38  ;;  %2079 = vmatprep.subr.bf16.mxu0 %v3290_v37  ;;  %v3348_v37 = vld [vmem:[%s3844_s9] sm:$0xff]  }
 0x1d7   :  { %2080 = vmatpush1.bf16.msra.mxu0 %v3288_v39  ;;  %v3349_v39 = vld [vmem:[%s3844_s9 + $0x8] sm:$0xff]  }
 0x1d8   :  { %2081 = vmatprep.subr.bf16.mxu0 %v3293_v40  ;;  %v3350_v40 = vld [vmem:[%s3844_s9 + $0x10] sm:$0xff]  }
 0x1db   :  { %2082 = vmatpush1.bf16.msra.mxu0 %v3291_v41  ;;  %v3351_v41 = vld [vmem:[%s3844_s9 + $0x18] sm:$0xff]  }
 0x1dc   :  { %2083 = vmatprep.subr.bf16.mxu0 %v3296_v42  ;;  %v2802_v42 = vld [vmem:[%s3843_s8] ss:$0 sm:$0xff]  ;;  %s3438_s8 = smov [#allocation7]  }
 0x1dd   :  { %s2506_s9 = sshll.u32 %s3438_s8, 4  ;;  %s2507_s9 = int_to_ptr.vmem [resolvable:$true] %s2506_s9 }
 0x1de   :  { %p3406_p3 = scmp.lt.s32.totalorder %s2507_s9, %s2507_s9 }
 0x1df   :  { %2084 = vmatpush1.bf16.msra.mxu0 %v3294_v43 }
 0x1e0   :  { %2085 = vmatprep.subr.bf16.mxu0 %v3299_v44 }
 0x1e3   :  { %2086 = vmatpush1.bf16.msra.mxu0 %v3297_v45 }
 0x1e4   :  { %2087 = vmatprep.subr.bf16.mxu0 %v3302_v46 }
 0x1e7   :  { %2088 = vmatpush1.bf16.msra.mxu0 %v3300_v47 }
 0x1e8   :  { %2089 = vmatprep.subr.bf16.mxu0 %v3305_v48 }
 0x1eb   :  { %2090 = vmatpush1.bf16.msra.mxu0 %v3303_v49 }
 0x1ec   :  { %2091 = vmatprep.subr.bf16.mxu0 %v3308_v50  ;;  %v2811_v50 = vld [vmem:[%s3845_s10] ss:$0 sm:$0xff]  ;;  %s3401_s10 = scalar_lea.vmem %s2507_s9, 128 }
 0x1ed   :  { %p3402_p2 = scmp.ne.s32.totalorder %s2507_s9, %s3401_s10  ;;  %p3407_p4 = scmp.lt.s32.totalorder %s3401_s10, %s3401_s10 }
 0x1ef   :  { %2092 = vmatpush1.bf16.msra.mxu0 %v3306_v51  ;;  %p3408_p5 = por %p3407_p4, %p3406_p3 }
 0x1f0   :  { %2093 = vmatprep.subr.bf16.mxu0 %v3311_v52 }
 0x1f1   :  { %p3409_p6 = pnand %p3408_p5, %p3402_p2 }
 0x1f3   :  { %2094 = vmatpush1.bf16.msra.mxu0 %v3309_v53 }
 0x1f4   :  { %2095 = vmatprep.subr.bf16.mxu0 %v3314_v54 }
 0x1f7   :  { %2096 = vmatpush1.bf16.msra.mxu0 %v3312_v55 }
 0x1f8   :  { %2097 = vmatprep.subr.bf16.mxu0 %v3317_v57 }
 0x1fb   :  { %2098 = vmatpush1.bf16.msra.mxu0 %v3315_v58 }
 0x1fc   :  { %2099 = vmatprep.subr.bf16.mxu0 %v3320_v60 }
 0x1ff   :  { %2100 = vmatpush1.bf16.msra.mxu0 %v3318_v61 }
 0x200   :  { %2101 = vmatprep.subr.bf16.mxu0 %v3323_v63 }
 0x203   :  { %2102 = vmatpush1.bf16.msra.mxu0 %v3321_v1 }
 0x206   :  { %2104 = vmatmul.mubr.bf16.vlgmr.msra.gmra.mrb[4].mxu0 %v1632_v3 }
 0x2d9   :  { %v2105_v15 = vpop.f32.mrb[4].mxu0 }
 0x2da   :  { %v2891_v17 = vadd.f32 %v2105_v15, %v1703_v13  ;;  %v2107_v18 = vpop.f32.mrb[5].mxu0 }
 0x2db   :  { %v2892_v19 = vadd.f32 %v2107_v18, %v1707_v14  ;;  %v2109_v20 = vpop.f32.mrb[6].mxu0 }
 0x2dc   :  { %v2112_v21 = vmax.f32 %v2891_v17, 0.0  ;;  %v2110_v16 = vpop.f32.mrb[7].mxu0 }
 0x2dd   :  { %v2113_v22 = vmax.f32 %v2892_v19, 0.0 }
 0x2de   :  { %v2114_v25 = vpack.c.bf16 %v2112_v21, %v2112_v21 }
 0x2df   :  { %v2115_v23 = vpack.c.bf16 %v2113_v22, %v2113_v22 }
 0x2e1   :  { %2283 = vmatprep.mubr.bf16.mxu1 %v2115_v23 }
 0x2e2   :  { %2284 = vmatmul.mubr.bf16.vlgmr.msra.gmra.mrb[8].mxu1 %v2114_v25 }
 0x2e3   :  { %2854 = vmatpush3.bf16.msra.mxu1 %v3340_v24  ;;  %2869 = vmatprep.mubr.msk.bf16.mxu1 %vm3437_vm1, %v3436_v11 }
 0x2e4   :  { %2855 = vmatprep.subr.bf16.mxu1 %v3436_v11 }
 0x2e7   :  { %2856 = vmatpush3.bf16.msra.mxu1 %v3341_v5 }
 0x2e8   :  { %2857 = vmatprep.subr.bf16.mxu1 %v3436_v11 }
 0x2eb   :  { %2858 = vmatpush3.bf16.msra.mxu1 %v3342_v6 }
 0x2ec   :  { %2859 = vmatprep.subr.bf16.mxu1 %v3436_v11 }
 0x2ef   :  { %2860 = vmatpush3.bf16.msra.mxu1 %v3343_v8 }
 0x2f0   :  { %2861 = vmatprep.subr.bf16.mxu1 %v3436_v11 }
 0x2f3   :  { %2862 = vmatpush3.bf16.msra.mxu1 %v3344_v0 }
 0x2f4   :  { %2863 = vmatprep.subr.bf16.mxu1 %v3436_v11 }
 0x2f7   :  { %2864 = vmatpush3.bf16.msra.mxu1 %v3345_v26 }
 0x2f8   :  { %2865 = vmatprep.subr.bf16.mxu1 %v3436_v11 }
 0x2fb   :  { %2866 = vmatpush3.bf16.msra.mxu1 %v3346_v27 }
 0x2fc   :  { %2867 = vmatprep.subr.bf16.mxu1 %v3436_v11 }
 0x2ff   :  { %2868 = vmatpush3.bf16.msra.mxu1 %v3347_v28 }
 0x300   :  { %2873 = vmatprep.subr.bf16.mxu1 %v3436_v11 }
 0x3b5   :  { %v2833_v29 = vpop.f32.mrb[8].mxu1 }
 0x3b6   :  { %v2834_v31 = vpop.f32.mrb[9].mxu1 }
 0x3b7   :  { %v2835_v32 = vadd.f32 %v2834_v31, %v2833_v29  ;;  %v2836_v33 = vpop.f32.mrb[10].mxu1 }
 0x3b8   :  { %v2837_v34 = vpop.f32.mrb[11].mxu1 }
 0x3b9   :  { %v2286_v35 = vadd.f32 %v2835_v32, %v2785_v30 }
 0x3bb   :  { %v2291_v36 = vmax.f32 %v2286_v35, 0.0 }
 0x3bd   :  { %v2292_v38 = vpack.c.bf16 %v2291_v36, %v2291_v36 }
 0x3bf   :  { %2870 = vmatmul.mubr.bf16.vlgmr.msra.gmra.mrb[12].mxu1 %v2292_v38 }
 0x3c0   :  { %2874 = vmatpush3.bf16.msra.mxu1 %v3348_v37  ;;  %2881 = vmatprep.mubr.msk.bf16.mxu1 %vm3437_vm1, %v3436_v11 }
 0x3c1   :  { %2875 = vmatprep.subr.bf16.mxu1 %v3436_v11 }
 0x3c4   :  { %2876 = vmatpush3.bf16.msra.mxu1 %v3349_v39 }
 0x3c5   :  { %2877 = vmatprep.subr.bf16.mxu1 %v3436_v11 }
 0x3c8   :  { %2878 = vmatpush3.bf16.msra.mxu1 %v3350_v40 }
 0x3c9   :  { %2879 = vmatprep.subr.bf16.mxu1 %v3436_v11 }
 0x3cc   :  { %2880 = vmatpush3.bf16.msra.mxu1 %v3351_v41 }
 0x492   :  { %v2398_v43 = vpop.f32.mrb[12].mxu1 }
 0x493   :  { %v2399_v44 = vadd.f32 %v2802_v42, %v2398_v43  ;;  %v2871_v45 = vpop.f32.mrb[13].mxu1 }
 0x494   :  { %v2401_v46 = vpop.f32.mrb[14].mxu1 }
 0x495   :  { %v2404_v47 = vmax.f32 %v2399_v44, 0.0  ;;  %v2872_v48 = vpop.f32.mrb[15].mxu1 }
 0x497   :  { %v2405_v49 = vpack.c.bf16 %v2404_v47, %v2404_v47 }
 0x499   :  { %2882 = vmatmul.mubr.msk.bf16.vlgmr.msra.gmra.mrb[16].mxu1 %vm2445_vm2, %v2405_v49 }
 0x56c   :  { %v2483_v51 = vpop.f32.mrb[16].mxu1 }
 0x56d   :  { %v2484_v52 = vadd.f32 %v2811_v50, %v2483_v51  ;;  %v2883_v53 = vpop.f32.mrb[17].mxu1 }
 0x56e   :  { %v2486_v54 = vpop.f32.mrb[18].mxu1 }
 0x56f   :  { %2489 = vmax.xlane.f32.xlu0 %v2484_v52  ;;  %v2884_v55 = vpop.f32.mrb[19].mxu1 }
 0x5fc   :  { %v2490_v56 = vpop.xlane.xlu0 %2489 }
 0x5fd   :  { %v2491_v57 = vsub.f32 %v2484_v52, %v2490_v56 }
 0x5ff   :  { %v2492_v58 = vmul.f32 1.442695, %v2491_v57 }
 0x601   :  { %3352 = vpow2.f32 %v2492_v58 }
 0x60b   :  { %v3353_v59 = vpop.eup %3352 }
 0x60c   :  { %2494 = vadd.xlane.f32.xlu0 %v3353_v59 }
 0x699   :  { %v2495_v60 = vpop.xlane.xlu0 %2494 }
 0x69a   :  { %3354 = vlog2.f32 %v2495_v60 }
 0x6a4   :  { %v3355_v61 = vpop.eup %3354 }
 0x6a5   :  { %v2497_v62 = vmul.f32 0.6931472, %v3355_v61 }
 0x6a7   :  { %v2498_v63 = vsub.f32 %v2491_v57, %v2497_v62 }
 0x6a9   :  { %2499 = vst [vmem:[#allocation7] sm:$0xff] %v2498_v63 }
 0x6aa   :  { %3412 = shalt.err (!%p3409_p6)
}
 0x6ab   :  { %s3413_s16 = scalar_lea.hbm %s3846_s11, 128 }
 0x6ac   :  { %p3414_p7 = scmp.ne.s32.totalorder %s3846_s11, %s3413_s16  ;;  %p3417_p8 = scmp.lt.u32.totalorder %s3413_s16, %s3846_s11 }
 0x6ae   :  { %p3419_p9 = pnand %p3417_p8, %p3414_p7 }
 0x6b0   :  { %3422 = shalt.err (!%p3419_p9)
}
 0x6b1   :  { %2509 = dma.vmem_to_hbm [thread:$0]  %s2507_s9, 128, %s3846_s11, [#allocation4]  }
 0x6b2   :  { %3427 = dma.done.wait [#allocation4], 128  }
 0x6b3   :  { %3428 = vsyncadd [#allocation4], 4294967168 }
 0x6b4   :  { %2513 = vsyncpa [#allocation3], 1 }
 0x6b5   :  { %2514 = vsyncpa [#allocation6], 1 }
 0x6b6   :  { %2515 = vsyncpa [#allocation4], 1 }

</bundles_post_ra>
